<compile_context>
chip_gen: v5e
topology: v5e:2x2
jax: 0.10.0
libtpu: 0.0.40
codegen_flags: <defaults>
</compile_context>

<pallas_src>
import functools

import jax
import jax.numpy as jnp
from jax.experimental import pallas as pl
from jax.experimental.pallas import tpu as pltpu


NUM_CLASSES = 10          # CIFAR-10
FEAT_DIM = 512            # VGG conv output: 512 x 1 x 1 on 32x32 input
PADDED_CLASSES = 128      # lane-dense output slab (last dim = one full vreg lane width)


def vgg_classifier_kernel(x_ref, w1_ref, b1_ref, w2_ref, b2_ref, w3_ref, b3_ref,
                          o_ref):
    """Fused 512 -> 512 -> 512 -> 10(padded to 128) classifier head.

    Dropout layers are identity in inference mode.
    All matmuls hit the MXU with K = 512, N in {512, 128}; accumulation in f32.
    """
    x = x_ref[...]                                                   # (tm, 512)
    h = jnp.dot(x, w1_ref[...], preferred_element_type=jnp.float32)  # (tm, 512)
    h = jnp.maximum(h + b1_ref[...], 0.0)                            # bias + ReLU (VPU)
    h = jnp.dot(h, w2_ref[...], preferred_element_type=jnp.float32)  # (tm, 512)
    h = jnp.maximum(h + b2_ref[...], 0.0)
    y = jnp.dot(h, w3_ref[...], preferred_element_type=jnp.float32)  # (tm, 128) lane-dense
    y = y + b3_ref[...]
    o_ref[...] = y.astype(o_ref.dtype)                               # unmasked vst


@functools.partial(jax.jit, static_argnames=("tm",))
def cifar10_vgg_forward(x, w1, b1, w2, b2, w3p, b3p, *, tm=8):
    """Forward pass of CIFAR10_VGG given post-conv features.

    x   : (B, C, H, W) float32 with C*H*W == 512 (e.g. (B, 512, 1, 1))
    w*  : (in, out) weights; w3p/b3p are zero-padded to 128 output lanes.
    Returns (B, 10) float32 logits.
    """
    B = x.shape[0]
    feats = x.reshape(B, -1)                    # x.view(x.size(0), -1)
    D = feats.shape[1]

    # Pad the batch to a multiple of the row tile (tm is a multiple of 8).
    B_pad = ((B + tm - 1) // tm) * tm
    if B_pad != B:
        feats = jnp.pad(feats, ((0, B_pad - B), (0, 0)))

    NP = w3p.shape[1]                           # 128 (padded classes)

    out_padded = pl.pallas_call(
        vgg_classifier_kernel,
        out_shape=jax.ShapeDtypeStruct((B_pad, NP), feats.dtype),
        grid=(B_pad // tm,),
        in_specs=[
            # streamed activation tile
            pl.BlockSpec((tm, D), lambda i: (i, 0)),
            # VMEM-resident weights / biases (grid-invariant block index)
            pl.BlockSpec((D, D), lambda i: (0, 0)),      # w1 (512, 512)
            pl.BlockSpec((1, D), lambda i: (0, 0)),      # b1 (1, 512)  lane-dense
            pl.BlockSpec((D, D), lambda i: (0, 0)),      # w2 (512, 512)
            pl.BlockSpec((1, D), lambda i: (0, 0)),      # b2 (1, 512)
            pl.BlockSpec((D, NP), lambda i: (0, 0)),     # w3 (512, 128) padded
            pl.BlockSpec((1, NP), lambda i: (0, 0)),     # b3 (1, 128)   padded
        ],
        out_specs=pl.BlockSpec((tm, NP), lambda i: (i, 0)),
        compiler_params=pltpu.CompilerParams(
            dimension_semantics=("parallel",),           # batch axis is embarrassingly parallel
        ),
    )(feats, w1, b1, w2, b2, w3p, b3p)

    # Slice off batch padding and the zero-padded logit lanes.
    return out_padded[:B, :NUM_CLASSES]


def init_classifier_params(key):
    """Params for the fc head, normal(0, 0.01) weights / zero biases
    (the init intended by CIFAR10_VGG._initialize_weights for nn.Linear).

    Weights are stored (in, out) so the kernel computes x @ W; PyTorch's
    nn.Linear (out, in) layout is transposed here.
    """
    k1, k2, k3 = jax.random.split(key, 3)

    w1_t = 0.01 * jax.random.normal(k1, (FEAT_DIM, FEAT_DIM), jnp.float32)  # (out, in)
    w2_t = 0.01 * jax.random.normal(k2, (FEAT_DIM, FEAT_DIM), jnp.float32)
    w3_t = 0.01 * jax.random.normal(k3, (NUM_CLASSES, FEAT_DIM), jnp.float32)

    w1 = w1_t.T                                   # (512, 512)
    w2 = w2_t.T                                   # (512, 512)
    w3 = w3_t.T                                   # (512, 10)
    b1 = jnp.zeros((1, FEAT_DIM), jnp.float32)
    b2 = jnp.zeros((1, FEAT_DIM), jnp.float32)
    b3 = jnp.zeros((1, NUM_CLASSES), jnp.float32)

    # Zero-pad the final layer to 128 output lanes for lane-dense stores.
    w3p = jnp.pad(w3, ((0, 0), (0, PADDED_CLASSES - NUM_CLASSES)))
    b3p = jnp.pad(b3, ((0, 0), (0, PADDED_CLASSES - NUM_CLASSES)))
    return (w1, b1, w2, b2, w3, b3, w3p, b3p)


def classifier_reference(feats, w1, b1, w2, b2, w3, b3):
    """Plain-JAX reference (dropout = identity in eval)."""
    h = jnp.maximum(feats @ w1 + b1, 0.0)
    h = jnp.maximum(h @ w2 + b2, 0.0)
    return h @ w3 + b3


if __name__ == "__main__":
    key = jax.random.PRNGKey(0)
    k_params, k_x = jax.random.split(key)

    w1, b1, w2, b2, w3, b3, w3p, b3p = init_classifier_params(k_params)

    # Post-conv VGG feature map on CIFAR-10: (B, 512, 1, 1). Small batch.
    batch = 16
    x = jax.random.normal(k_x, (batch, FEAT_DIM, 1, 1), jnp.float32)

    out = cifar10_vgg_forward(x, w1, b1, w2, b2, w3p, b3p, tm=8)
    out = jax.block_until_ready(out)

    feats = x.reshape(batch, -1)
    ref = classifier_reference(feats, w1, b1, w2, b2, w3, b3)

    assert out.shape == (batch, NUM_CLASSES), out.shape
    assert jnp.allclose(out, ref, atol=1e-4, rtol=1e-4), (out, ref)

    print("KERNEL_OK")
</pallas_src>

<mosaic_0001>
module attributes {stable_mosaic.version = 11 : i64} {
  func.func @vgg_classifier_kernel(%arg0: i32, %arg1: memref<8x512xf32, #tpu.memory_space<vmem>>, %arg2: memref<512x512xf32, #tpu.memory_space<vmem>>, %arg3: memref<1x512xf32, #tpu.memory_space<vmem>>, %arg4: memref<512x512xf32, #tpu.memory_space<vmem>>, %arg5: memref<1x512xf32, #tpu.memory_space<vmem>>, %arg6: memref<512x128xf32, #tpu.memory_space<vmem>>, %arg7: memref<1x128xf32, #tpu.memory_space<vmem>>, %arg8: memref<8x128xf32, #tpu.memory_space<vmem>>) attributes {dimension_semantics = [#tpu.dimension_semantics<parallel>], iteration_bounds = array<i64: 2>, scalar_prefetch = 0 : i64, scratch_operands = 0 : i64, tpu.core_type = #tpu.core_type<tc>, window_params = [{transform_indices = @transform_0, window_bounds = array<i64: 8, 512>}, {pipeline_mode = #tpu.pipeline_mode<synchronous>, transform_indices = @transform_1, window_bounds = array<i64: 512, 512>}, {pipeline_mode = #tpu.pipeline_mode<synchronous>, transform_indices = @transform_2, window_bounds = array<i64: 1, 512>}, {pipeline_mode = #tpu.pipeline_mode<synchronous>, transform_indices = @transform_3, window_bounds = array<i64: 512, 512>}, {pipeline_mode = #tpu.pipeline_mode<synchronous>, transform_indices = @transform_4, window_bounds = array<i64: 1, 512>}, {pipeline_mode = #tpu.pipeline_mode<synchronous>, transform_indices = @transform_5, window_bounds = array<i64: 512, 128>}, {pipeline_mode = #tpu.pipeline_mode<synchronous>, transform_indices = @transform_6, window_bounds = array<i64: 1, 128>}, {transform_indices = @transform_7, window_bounds = array<i64: 8, 128>}]} {
    %c0 = arith.constant 0 : index
    %c0_0 = arith.constant 0 : index
    %0 = vector.load %arg1[%c0, %c0_0] : memref<8x512xf32, #tpu.memory_space<vmem>>, vector<8x512xf32>
    %c0_1 = arith.constant 0 : index
    %c0_2 = arith.constant 0 : index
    %1 = vector.load %arg2[%c0_1, %c0_2] : memref<512x512xf32, #tpu.memory_space<vmem>>, vector<512x512xf32>
    %cst = arith.constant dense<0.000000e+00> : vector<8x512xf32>
    %2 = tpu.matmul %0, %1, %cst {dimension_numbers = #tpu.dot_dimension_numbers<[1], [0], [0], [1], [0, 0, 1, 1], [], []>} : vector<8x512xf32>, vector<512x512xf32>, vector<8x512xf32> -> vector<8x512xf32>
    %c0_3 = arith.constant 0 : index
    %c0_4 = arith.constant 0 : index
    %3 = vector.load %arg3[%c0_3, %c0_4] : memref<1x512xf32, #tpu.memory_space<vmem>>, vector<1x512xf32>
    %4 = vector.broadcast %3 : vector<1x512xf32> to vector<8x512xf32>
    %5 = arith.addf %2, %4 : vector<8x512xf32>
    %cst_5 = arith.constant 0.000000e+00 : f32
    %6 = vector.broadcast %cst_5 : f32 to vector<8x512xf32>
    %7 = arith.maximumf %5, %6 : vector<8x512xf32>
    %c0_6 = arith.constant 0 : index
    %c0_7 = arith.constant 0 : index
    %8 = vector.load %arg4[%c0_6, %c0_7] : memref<512x512xf32, #tpu.memory_space<vmem>>, vector<512x512xf32>
    %cst_8 = arith.constant dense<0.000000e+00> : vector<8x512xf32>
    %9 = tpu.matmul %7, %8, %cst_8 {dimension_numbers = #tpu.dot_dimension_numbers<[1], [0], [0], [1], [0, 0, 1, 1], [], []>} : vector<8x512xf32>, vector<512x512xf32>, vector<8x512xf32> -> vector<8x512xf32>
    %c0_9 = arith.constant 0 : index
    %c0_10 = arith.constant 0 : index
    %10 = vector.load %arg5[%c0_9, %c0_10] : memref<1x512xf32, #tpu.memory_space<vmem>>, vector<1x512xf32>
    %11 = vector.broadcast %10 : vector<1x512xf32> to vector<8x512xf32>
    %12 = arith.addf %9, %11 : vector<8x512xf32>
    %cst_11 = arith.constant 0.000000e+00 : f32
    %13 = vector.broadcast %cst_11 : f32 to vector<8x512xf32>
    %14 = arith.maximumf %12, %13 : vector<8x512xf32>
    %c0_12 = arith.constant 0 : index
    %c0_13 = arith.constant 0 : index
    %15 = vector.load %arg6[%c0_12, %c0_13] : memref<512x128xf32, #tpu.memory_space<vmem>>, vector<512x128xf32>
    %cst_14 = arith.constant dense<0.000000e+00> : vector<8x128xf32>
    %16 = tpu.matmul %14, %15, %cst_14 {dimension_numbers = #tpu.dot_dimension_numbers<[1], [0], [0], [1], [0, 0, 1, 1], [], []>} : vector<8x512xf32>, vector<512x128xf32>, vector<8x128xf32> -> vector<8x128xf32>
    %c0_15 = arith.constant 0 : index
    %c0_16 = arith.constant 0 : index
    %17 = vector.load %arg7[%c0_15, %c0_16] : memref<1x128xf32, #tpu.memory_space<vmem>>, vector<1x128xf32>
    %18 = vector.broadcast %17 : vector<1x128xf32> to vector<8x128xf32>
    %19 = arith.addf %16, %18 : vector<8x128xf32>
    %c0_17 = arith.constant 0 : index
    %c0_18 = arith.constant 0 : index
    %20 = vector.load %arg8[%c0_17, %c0_18] : memref<8x128xf32, #tpu.memory_space<vmem>>, vector<8x128xf32>
    tpu.vector_store %arg8[%c0_17, %c0_18], %19 {strides = array<i32>} : memref<8x128xf32, #tpu.memory_space<vmem>>, vector<8x128xf32>,
    return
  }
  func.func @transform_0(%arg0: i32) -> (i32, i32) {
    %c0_i32 = arith.constant 0 : i32
    %c0_i32_0 = arith.constant 0 : i32
    return %arg0, %c0_i32 : i32, i32
  }
  func.func @transform_1(%arg0: i32) -> (i32, i32) {
    %c0_i32 = arith.constant 0 : i32
    %c0_i32_0 = arith.constant 0 : i32
    %c0_i32_1 = arith.constant 0 : i32
    return %c0_i32, %c0_i32_0 : i32, i32
  }
  func.func @transform_2(%arg0: i32) -> (i32, i32) {
    %c0_i32 = arith.constant 0 : i32
    %c0_i32_0 = arith.constant 0 : i32
    %c0_i32_1 = arith.constant 0 : i32
    return %c0_i32, %c0_i32_0 : i32, i32
  }
  func.func @transform_3(%arg0: i32) -> (i32, i32) {
    %c0_i32 = arith.constant 0 : i32
    %c0_i32_0 = arith.constant 0 : i32
    %c0_i32_1 = arith.constant 0 : i32
    return %c0_i32, %c0_i32_0 : i32, i32
  }
  func.func @transform_4(%arg0: i32) -> (i32, i32) {
    %c0_i32 = arith.constant 0 : i32
    %c0_i32_0 = arith.constant 0 : i32
    %c0_i32_1 = arith.constant 0 : i32
    return %c0_i32, %c0_i32_0 : i32, i32
  }
  func.func @transform_5(%arg0: i32) -> (i32, i32) {
    %c0_i32 = arith.constant 0 : i32
    %c0_i32_0 = arith.constant 0 : i32
    %c0_i32_1 = arith.constant 0 : i32
    return %c0_i32, %c0_i32_0 : i32, i32
  }
  func.func @transform_6(%arg0: i32) -> (i32, i32) {
    %c0_i32 = arith.constant 0 : i32
    %c0_i32_0 = arith.constant 0 : i32
    %c0_i32_1 = arith.constant 0 : i32
    return %c0_i32, %c0_i32_0 : i32, i32
  }
  func.func @transform_7(%arg0: i32) -> (i32, i32) {
    %c0_i32 = arith.constant 0 : i32
    %c0_i32_0 = arith.constant 0 : i32
    return %arg0, %c0_i32 : i32, i32
  }
}

</mosaic_0001>

<bundles_post_ra>
// kernel: cifar10_vgg_forward.1
= control target key start
LH: loop header
LB: loop body
LE: loop exit
PB: predicated region body
PF: predicated region fallthrough
CT: control target
= control target key end

     0   :  { %s2271_s0 = inlined_call_operand.vmem [shape: f32[16,512], index: 0, kind: input, shape index: {}]   ;;  %s2272_s1 = inlined_call_operand.hbm [shape: f32[512,512], index: 1, kind: input, shape index: {}]   ;;  %s2273_s2 = inlined_call_operand.vmem [shape: f32[1,512], index: 2, kind: input, shape index: {}]   ;;  %s2274_s3 = inlined_call_operand.hbm [shape: f32[512,512], index: 3, kind: input, shape index: {}]   ;;  %s2275_s4 = inlined_call_operand.vmem [shape: f32[1,512], index: 4, kind: input, shape index: {}]   ;;  %s2276_s5 = inlined_call_operand.hbm [shape: f32[512,128], index: 5, kind: input, shape index: {}]   ;;  %s2277_s6 = inlined_call_operand.vmem [shape: f32[1,128], index: 6, kind: input, shape index: {}]   ;;  %s2278_s7 = inlined_call_operand.hbm [shape: f32[16,128], index: 7, kind: output, shape index: {}]  }
   0x1   :  { %2279 = sst [smem:[#allocation12_spill]] %s2272_s1 }
   0x2   :  { %2280 = sst [smem:[#allocation13_spill]] %s2274_s3 }
   0x3   :  { %12 = vsyncpa [#allocation3], 0 }
   0x4   :  { %13 = vsyncpa [#allocation6], 0 }
   0x5   :  { %14 = vsyncpa [#allocation4], 0 }
   0x6   :  { %16 = vsyncpa [#allocation4 + $0x1], 0  ;;  %s2068_s24 = smov 0   ;;  %s2070_s25 = smov 0  }
   0x7   :  { %s2072_s26 = smov 0   ;;  %s2074_s27 = smov 0  }
   0x8 LB: > { %s2089_s28 = sadd.s32 4294967295, %s2019_s27   ;;  %s1766_s29 = sadd.s32 4294967294, %s2019_s27   ;;  %s2019_s27 = sphi %s2074_s27, %s2290_s27   ;;  %s2015_s26 = sphi %s2072_s26, %s2289_s26   ;;  %s2011_s25 = sphi %s2070_s25, %s2288_s25   ;;  %s2007_s24 = sphi %s2068_s24, %s2287_s24  }
   0x9   : > { %s2093_s30 = sadd.s32 1, %s2019_s27   ;;  %s181_s8 = sadd.s32 1, %s2015_s26 }
   0xa   : > { %s178_s9 = ssub.s32 %s2019_s27, %s2093_s30  ;;  %p191_p0 = scmp.ne.s32.totalorder %s2015_s26, %s2011_s25 }
   0xb   : > { %p179_p1 = scmp.eq.s32.totalorder %s178_s9, 0  ;;  %p192_p2 = scmp.eq.s32.totalorder %s2089_s28, 1 }
   0xc   : > { %p197_p3 = scmp.ne.s32.totalorder %s2011_s25, %s2007_s24  ;;  %p198_p4 = scmp.eq.s32.totalorder %s1766_s29, 1 }
   0xd   : > { %s2104_s10 = scalar_select %p179_p1, %s2015_s26, %s181_s8  }
   0xe   : > { %p2106_p5 = por %p192_p2, %p191_p0  ;;  %p2110_p6 = por %p198_p4, %p197_p3 }
   0xf   : > { %p1767_p7 = scmp.ge.s32.totalorder %s2019_s27, 1  ;;  %p205_p8 = scmp.lt.s32.totalorder %s2019_s27, 3 }
  0x10   : > { %p1812_p9 = scmp.eq.s32.totalorder %s2089_s28, 0  ;;  %s2284_s3 = sld [smem:[#allocation13_spill]] }
  0x11   : > { %p2117_p10 = pnand %p1767_p7, %p205_p8  ;;  %s2285_s1 = sld [smem:[#allocation12_spill]] }
  0x12   : > { %s2021_s21 = smov [#allocation5]   ;;  %s2022_s23 = smov 512  }
  0x13   : > { %p1798_p11 = pneg %p2117_p10  ;;  %s235_s22 = sshll.u32 %s2021_s21, 4  ;;  %s236_s22 = int_to_ptr.vmem [resolvable:$true] %s235_s22 }
  0x14   : > { %s2023_s29 = smov 32   ;;  %s2024_s8 = smov [#allocation2]  }
  0x15   : > { %p2131_p12 = pnand %p1812_p9, %p1798_p11  ;;  %s218_s9 = sshll.u32 %s2024_s8, 4  ;;  %s219_s9 = int_to_ptr.vmem [resolvable:$true] %s218_s9 }
  0x16   : > { %s233_s16 = sshll.u32 %s2284_s3, 4  ;;  %s250_s17 = sshll.u32 %s2276_s5, 4  ;;  %s234_s16 = int_to_ptr.hbm [resolvable:$true] %s233_s16  ;;  %s251_s17 = int_to_ptr.hbm [resolvable:$true] %s250_s17 }
  0x17   : > { %s216_s19 = sshll.u32 %s2285_s1, 4  ;;  %s2025_s18 = smov [#allocation7]   ;;  %s217_s19 = int_to_ptr.hbm [resolvable:$true] %s216_s19 }
  0x18   : > { %1804 = dma.hbm_to_vmem [thread:$0]  (!%p2131_p12), %s234_s16, 32768, %s236_s22, [#allocation6], %s2022_s23, %s2022_s23, %s2023_s29  }
  0x19   : > { %1801 = dma.hbm_to_vmem [thread:$0]  (!%p2131_p12), %s217_s19, 32768, %s219_s9, [#allocation3], %s2022_s23, %s2022_s23, %s2023_s29  }
  0x1a   : > { %s252_s1 = sshll.u32 %s2025_s18, 4  ;;  %s2026_s21 = smov 128   ;;  %s253_s1 = int_to_ptr.vmem [resolvable:$true] %s252_s1 }
  0x1b   : > { %s2027_s3 = smov 8   ;;  %279 = sbr.rel (%p2117_p10) target bundleno = 674 (0x2a2), region = 48 }
  0x1c   : > { %1807 = dma.hbm_to_vmem [thread:$0]  (!%p2131_p12), %s251_s17, 8192, %s253_s1, [#allocation6], %s2026_s21, %s2026_s21, %s2027_s3  }
  0x20   : > { %1994 = dma.done.wait (%p1812_p9), [#allocation3], 32768  }
  0x21   : > { %1996 = vsyncadd (%p1812_p9), [#allocation3], 4294934528 }
  0x22   : > { %1998 = dma.done.wait (%p1812_p9), [#allocation6], 40960  }
  0x23   : > { %2000 = vsyncadd (%p1812_p9), [#allocation6], 4294926336  ;;  %v391_v0 = vld [vmem:[#allocation2 + $0x1e0] sm:$0xff]  ;;  %v392_v61 = vld [vmem:[#allocation2 + $0x1e8] sm:$0xff]  ;;  %p322_p13 = scmp.lt.s32.totalorder %s2089_s28, 1  ;;  %s319_s8 = sand.u32 1, %s2011_s25  }
  0x24   : > { %v519_v1 = vld [vmem:[#allocation2 + $0x5e0] sm:$0xff]  ;;  %597 = vmatpush.msra.mxu0 %v391_v0  ;;  %v520_v62 = vld [vmem:[#allocation2 + $0x5e8] sm:$0xff]  ;;  %s1776_s15 = sshll.u32 %s319_s8, 3  ;;  %s1780_s17 = sshll.u32 %s2089_s28, 3 }
  0x25   : > { %v387_v2 = vld [vmem:[#allocation2 + $0x1c0] sm:$0xff]  ;;  %637 = vmatpush.msra.mxu2 %v519_v1  ;;  %v388_v1 = vld [vmem:[#allocation2 + $0x1c8] sm:$0xff]  ;;  %s2158_s1 = scalar_select %p322_p13, %s2089_s28, 1 }
  0x26   : > { %v515_v3 = vld [vmem:[#allocation2 + $0x5c0] sm:$0xff]  ;;  %598 = vmatpush.msra.mxu0 %v387_v2  ;;  %v516_v2 = vld [vmem:[#allocation2 + $0x5c8] sm:$0xff]  ;;  %s1969_s29 = scalar_lea.hbm %s2278_s7, 16 }
  0x27   : > { %v583_v4 = vld [vmem:[#allocation2 + $0x7e0] sm:$0xff]  ;;  %638 = vmatpush.msra.mxu2 %v515_v3  ;;  %v584_v3 = vld [vmem:[#allocation2 + $0x7e8] sm:$0xff]  ;;  %s1783_s3 = sshll.u32 %s2158_s1, 5  ;;  %s1671_s1 = scalar_lea.hbm %s2278_s7, %s1780_s17 }
  0x28   : > { %v383_v5 = vld [vmem:[#allocation2 + $0x1a0] sm:$0xff]  ;;  %657 = vmatpush.msra.mxu3 %v583_v4  ;;  %s2164_s19 = scalar_lea.vmem %s2271_s0, %s1783_s3  ;;  %s321_s3 = scalar_lea.vmem [#allocation8], %s1776_s15 }
  0x29   : > { %v455_v6 = vld [vmem:[#allocation2 + $0x3e0] sm:$0xff]  ;;  %599 = vmatpush.msra.mxu0 %v383_v5  ;;  %v384_v5 = vld [vmem:[#allocation2 + $0x1a8] sm:$0xff]  ;;  %s1673_s13 = sshll.u32 %s321_s3, 4  ;;  %s1675_s16 = sshll.u32 %s1671_s1, 4  ;;  %s1674_s13 = int_to_ptr.vmem [resolvable:$true] %s1673_s13  ;;  %s1676_s16 = int_to_ptr.hbm [resolvable:$true] %s1675_s16 }
  0x2a   : > { %v511_v7 = vld [vmem:[#allocation2 + $0x5a0] sm:$0xff]  ;;  %617 = vmatpush.msra.mxu1 %v455_v6  ;;  %v456_v6 = vld [vmem:[#allocation2 + $0x3e8] sm:$0xff]  ;;  %s1963_s28 = sshra.s32 %s1676_s16, 4  ;;  %s1964_s28 = int_to_ptr.hbm [resolvable:$true] %s1963_s28 }
  0x2b   : > { %v579_v8 = vld [vmem:[#allocation2 + $0x7c0] sm:$0xff]  ;;  %639 = vmatpush.msra.mxu2 %v511_v7  ;;  %v512_v7 = vld [vmem:[#allocation2 + $0x5a8] sm:$0xff]  ;;  %s1965_s20 = scalar_lea.hbm %s1964_s28, 8  ;;  %p1970_p3 = scmp.lt.s32.totalorder %s1964_s28, %s2278_s7 }
  0x2c   : > { %v451_v9 = vld [vmem:[#allocation2 + $0x3c0] sm:$0xff]  ;;  %658 = vmatpush.msra.mxu3 %v579_v8  ;;  %v580_v8 = vld [vmem:[#allocation2 + $0x7c8] sm:$0xff]  ;;  %p1966_p0 = scmp.ne.s32.totalorder %s1964_s28, %s1965_s20  ;;  %p1971_p4 = scmp.lt.s32.totalorder %s1969_s29, %s1965_s20 }
  0x2d   : > { %v379_v10 = vld [vmem:[#allocation2 + $0x180] sm:$0xff]  ;;  %618 = vmatpush.msra.mxu1 %v451_v9  ;;  %v380_v9 = vld [vmem:[#allocation2 + $0x188] sm:$0xff] }
  0x2e   : > { %v507_v11 = vld [vmem:[#allocation2 + $0x580] sm:$0xff]  ;;  %600 = vmatpush.msra.mxu0 %v379_v10  ;;  %v452_v10 = vld [vmem:[#allocation2 + $0x3c8] sm:$0xff]  ;;  %p1967_p1 = pnand %p1966_p0, %p2106_p5  ;;  %p1972_p7 = por %p1971_p4, %p1970_p3 }
  0x2f   : > { %v575_v12 = vld [vmem:[#allocation2 + $0x7a0] sm:$0xff]  ;;  %640 = vmatpush.msra.mxu2 %v507_v11  ;;  %v508_v11 = vld [vmem:[#allocation2 + $0x588] sm:$0xff] }
  0x30   : > { %v447_v13 = vld [vmem:[#allocation2 + $0x3a0] sm:$0xff]  ;;  %659 = vmatpush.msra.mxu3 %v575_v12  ;;  %v576_v12 = vld [vmem:[#allocation2 + $0x7a8] sm:$0xff]  ;;  %p1968_p2 = pneg %p1967_p1 }
  0x31   : > { %v571_v14 = vld [vmem:[#allocation2 + $0x780] sm:$0xff]  ;;  %619 = vmatpush.msra.mxu1 %v447_v13  ;;  %v376_v13 = vld [vmem:[#allocation2 + $0x168] sm:$0xff] }
  0x32   : > { %v375_v15 = vld [vmem:[#allocation2 + $0x160] sm:$0xff]  ;;  %660 = vmatpush.msra.mxu3 %v571_v14  ;;  %v448_v14 = vld [vmem:[#allocation2 + $0x3a8] sm:$0xff]  ;;  %p1973_p8 = pnand %p1972_p7, %p1968_p2 }
  0x33   : > { %v503_v16 = vld [vmem:[#allocation2 + $0x560] sm:$0xff]  ;;  %601 = vmatpush.msra.mxu0 %v375_v15  ;;  %v504_v15 = vld [vmem:[#allocation2 + $0x568] sm:$0xff] }
  0x34   : > { %v443_v17 = vld [vmem:[#allocation2 + $0x380] sm:$0xff]  ;;  %641 = vmatpush.msra.mxu2 %v503_v16  ;;  %v572_v16 = vld [vmem:[#allocation2 + $0x788] sm:$0xff] }
  0x35   : > { %v567_v18 = vld [vmem:[#allocation2 + $0x760] sm:$0xff]  ;;  %620 = vmatpush.msra.mxu1 %v443_v17  ;;  %v372_v17 = vld [vmem:[#allocation2 + $0x148] sm:$0xff] }
  0x36   : > { %v371_v19 = vld [vmem:[#allocation2 + $0x140] sm:$0xff]  ;;  %661 = vmatpush.msra.mxu3 %v567_v18  ;;  %v444_v18 = vld [vmem:[#allocation2 + $0x388] sm:$0xff] }
  0x37   : > { %v499_v20 = vld [vmem:[#allocation2 + $0x540] sm:$0xff]  ;;  %602 = vmatpush.msra.mxu0 %v371_v19  ;;  %v500_v19 = vld [vmem:[#allocation2 + $0x548] sm:$0xff] }
  0x38   : > { %v439_v21 = vld [vmem:[#allocation2 + $0x360] sm:$0xff]  ;;  %642 = vmatpush.msra.mxu2 %v499_v20  ;;  %v568_v20 = vld [vmem:[#allocation2 + $0x768] sm:$0xff] }
  0x39   : > { %v563_v22 = vld [vmem:[#allocation2 + $0x740] sm:$0xff]  ;;  %621 = vmatpush.msra.mxu1 %v439_v21  ;;  %v368_v21 = vld [vmem:[#allocation2 + $0x128] sm:$0xff] }
  0x3a   : > { %v367_v23 = vld [vmem:[#allocation2 + $0x120] sm:$0xff]  ;;  %662 = vmatpush.msra.mxu3 %v563_v22  ;;  %v440_v22 = vld [vmem:[#allocation2 + $0x368] sm:$0xff] }
  0x3b   : > { %v495_v24 = vld [vmem:[#allocation2 + $0x520] sm:$0xff]  ;;  %603 = vmatpush.msra.mxu0 %v367_v23  ;;  %v496_v23 = vld [vmem:[#allocation2 + $0x528] sm:$0xff] }
  0x3c   : > { %v435_v25 = vld [vmem:[#allocation2 + $0x340] sm:$0xff]  ;;  %643 = vmatpush.msra.mxu2 %v495_v24  ;;  %v564_v24 = vld [vmem:[#allocation2 + $0x748] sm:$0xff] }
  0x3d   : > { %v559_v26 = vld [vmem:[#allocation2 + $0x720] sm:$0xff]  ;;  %622 = vmatpush.msra.mxu1 %v435_v25  ;;  %v364_v25 = vld [vmem:[#allocation2 + $0x108] sm:$0xff] }
  0x3e   : > { %v363_v27 = vld [vmem:[#allocation2 + $0x100] sm:$0xff]  ;;  %663 = vmatpush.msra.mxu3 %v559_v26  ;;  %v436_v26 = vld [vmem:[#allocation2 + $0x348] sm:$0xff] }
  0x3f   : > { %v491_v28 = vld [vmem:[#allocation2 + $0x500] sm:$0xff]  ;;  %604 = vmatpush.msra.mxu0 %v363_v27  ;;  %v492_v27 = vld [vmem:[#allocation2 + $0x508] sm:$0xff] }
  0x40   : > { %v431_v29 = vld [vmem:[#allocation2 + $0x320] sm:$0xff]  ;;  %644 = vmatpush.msra.mxu2 %v491_v28  ;;  %v560_v28 = vld [vmem:[#allocation2 + $0x728] sm:$0xff] }
  0x41   : > { %v555_v30 = vld [vmem:[#allocation2 + $0x700] sm:$0xff]  ;;  %623 = vmatpush.msra.mxu1 %v431_v29  ;;  %v360_v29 = vld [vmem:[#allocation2 + $0xe8] sm:$0xff] }
  0x42   : > { %v359_v31 = vld [vmem:[#allocation2 + $0xe0] sm:$0xff]  ;;  %664 = vmatpush.msra.mxu3 %v555_v30  ;;  %v432_v30 = vld [vmem:[#allocation2 + $0x328] sm:$0xff] }
  0x43   : > { %v487_v32 = vld [vmem:[#allocation2 + $0x4e0] sm:$0xff]  ;;  %605 = vmatpush.msra.mxu0 %v359_v31  ;;  %v488_v31 = vld [vmem:[#allocation2 + $0x4e8] sm:$0xff] }
  0x44   : > { %v427_v33 = vld [vmem:[#allocation2 + $0x300] sm:$0xff]  ;;  %645 = vmatpush.msra.mxu2 %v487_v32  ;;  %v556_v32 = vld [vmem:[#allocation2 + $0x708] sm:$0xff] }
  0x45   : > { %v551_v34 = vld [vmem:[#allocation2 + $0x6e0] sm:$0xff]  ;;  %624 = vmatpush.msra.mxu1 %v427_v33  ;;  %v2167_v33 = vld [vmem:[%s2164_s19 + $0x10] sm:$0xff] }
  0x46   : > { %v355_v35 = vld [vmem:[#allocation2 + $0xc0] sm:$0xff]  ;;  %665 = vmatpush.msra.mxu3 %v551_v34  ;;  %v356_v34 = vld [vmem:[#allocation2 + $0xc8] sm:$0xff] }
  0x47   : > { %v483_v36 = vld [vmem:[#allocation2 + $0x4c0] sm:$0xff]  ;;  %606 = vmatpush.msra.mxu0 %v355_v35  ;;  %v428_v35 = vld [vmem:[#allocation2 + $0x308] sm:$0xff] }
  0x48   : > { %v423_v37 = vld [vmem:[#allocation2 + $0x2e0] sm:$0xff]  ;;  %646 = vmatpush.msra.mxu2 %v483_v36  ;;  %v484_v36 = vld [vmem:[#allocation2 + $0x4c8] sm:$0xff] }
  0x49   : > { %v547_v38 = vld [vmem:[#allocation2 + $0x6c0] sm:$0xff]  ;;  %625 = vmatpush.msra.mxu1 %v423_v37  ;;  %v552_v37 = vld [vmem:[#allocation2 + $0x6e8] sm:$0xff] }
  0x4a   : > { %v351_v39 = vld [vmem:[#allocation2 + $0xa0] sm:$0xff]  ;;  %666 = vmatpush.msra.mxu3 %v547_v38 }
  0x4b   : > { %v479_v40 = vld [vmem:[#allocation2 + $0x4a0] sm:$0xff]  ;;  %607 = vmatpush.msra.mxu0 %v351_v39  ;;  %v2174_v39 = vld [vmem:[%s2164_s19 + $0x18] sm:$0xff] }
  0x4c   : > { %v419_v41 = vld [vmem:[#allocation2 + $0x2c0] sm:$0xff]  ;;  %647 = vmatpush.msra.mxu2 %v479_v40  ;;  %v352_v40 = vld [vmem:[#allocation2 + $0xa8] sm:$0xff] }
  0x4d   : > { %v543_v42 = vld [vmem:[#allocation2 + $0x6a0] sm:$0xff]  ;;  %626 = vmatpush.msra.mxu1 %v419_v41  ;;  %v424_v41 = vld [vmem:[#allocation2 + $0x2e8] sm:$0xff] }
  0x4e   : > { %v347_v43 = vld [vmem:[#allocation2 + $0x80] sm:$0xff]  ;;  %667 = vmatpush.msra.mxu3 %v543_v42  ;;  %v480_v42 = vld [vmem:[#allocation2 + $0x4a8] sm:$0xff] }
  0x4f   : > { %v475_v44 = vld [vmem:[#allocation2 + $0x480] sm:$0xff]  ;;  %608 = vmatpush.msra.mxu0 %v347_v43  ;;  %v548_v43 = vld [vmem:[#allocation2 + $0x6c8] sm:$0xff] }
  0x50   : > { %v415_v45 = vld [vmem:[#allocation2 + $0x2a0] sm:$0xff]  ;;  %648 = vmatpush.msra.mxu2 %v475_v44  ;;  %v2178_v44 = vld [vmem:[%s2164_s19 + $0x8] sm:$0xff] }
  0x51   : > { %v539_v46 = vld [vmem:[#allocation2 + $0x680] sm:$0xff]  ;;  %627 = vmatpush.msra.mxu1 %v415_v45  ;;  %v348_v45 = vld [vmem:[#allocation2 + $0x88] sm:$0xff] }
  0x52   : > { %v343_v47 = vld [vmem:[#allocation2 + $0x60] sm:$0xff]  ;;  %668 = vmatpush.msra.mxu3 %v539_v46  ;;  %v420_v46 = vld [vmem:[#allocation2 + $0x2c8] sm:$0xff] }
  0x53   : > { %v471_v48 = vld [vmem:[#allocation2 + $0x460] sm:$0xff]  ;;  %609 = vmatpush.msra.mxu0 %v343_v47  ;;  %v476_v47 = vld [vmem:[#allocation2 + $0x488] sm:$0xff] }
  0x54   : > { %v411_v49 = vld [vmem:[#allocation2 + $0x280] sm:$0xff]  ;;  %649 = vmatpush.msra.mxu2 %v471_v48  ;;  %v544_v48 = vld [vmem:[#allocation2 + $0x6a8] sm:$0xff] }
  0x55   : > { %v535_v50 = vld [vmem:[#allocation2 + $0x660] sm:$0xff]  ;;  %628 = vmatpush.msra.mxu1 %v411_v49  ;;  %v344_v49 = vld [vmem:[#allocation2 + $0x68] sm:$0xff] }
  0x56   : > { %v339_v51 = vld [vmem:[#allocation2 + $0x40] sm:$0xff]  ;;  %669 = vmatpush.msra.mxu3 %v535_v50  ;;  %v416_v50 = vld [vmem:[#allocation2 + $0x2a8] sm:$0xff] }
  0x57   : > { %v467_v52 = vld [vmem:[#allocation2 + $0x440] sm:$0xff]  ;;  %610 = vmatpush.msra.mxu0 %v339_v51  ;;  %v472_v51 = vld [vmem:[#allocation2 + $0x468] sm:$0xff] }
  0x58   : > { %v407_v53 = vld [vmem:[#allocation2 + $0x260] sm:$0xff]  ;;  %650 = vmatpush.msra.mxu2 %v467_v52  ;;  %v540_v52 = vld [vmem:[#allocation2 + $0x688] sm:$0xff] }
  0x59   : > { %v531_v54 = vld [vmem:[#allocation2 + $0x640] sm:$0xff]  ;;  %629 = vmatpush.msra.mxu1 %v407_v53  ;;  %v340_v53 = vld [vmem:[#allocation2 + $0x48] sm:$0xff] }
  0x5a   : > { %v335_v55 = vld [vmem:[#allocation2 + $0x20] sm:$0xff]  ;;  %670 = vmatpush.msra.mxu3 %v531_v54  ;;  %v412_v54 = vld [vmem:[#allocation2 + $0x288] sm:$0xff] }
  0x5b   : > { %v463_v56 = vld [vmem:[#allocation2 + $0x420] sm:$0xff]  ;;  %611 = vmatpush.msra.mxu0 %v335_v55  ;;  %v468_v55 = vld [vmem:[#allocation2 + $0x448] sm:$0xff] }
  0x5c   : > { %v403_v57 = vld [vmem:[#allocation2 + $0x240] sm:$0xff]  ;;  %651 = vmatpush.msra.mxu2 %v463_v56  ;;  %v536_v56 = vld [vmem:[#allocation2 + $0x668] sm:$0xff] }
  0x5d   : > { %v527_v58 = vld [vmem:[#allocation2 + $0x620] sm:$0xff]  ;;  %630 = vmatpush.msra.mxu1 %v403_v57  ;;  %v336_v57 = vld [vmem:[#allocation2 + $0x28] sm:$0xff] }
  0x5e   : > { %v331_v59 = vld [vmem:[#allocation2] sm:$0xff]  ;;  %671 = vmatpush.msra.mxu3 %v527_v58  ;;  %v408_v58 = vld [vmem:[#allocation2 + $0x268] sm:$0xff] }
  0x5f   : > { %v459_v60 = vld [vmem:[#allocation2 + $0x400] sm:$0xff]  ;;  %612 = vmatpush.msra.mxu0 %v331_v59  ;;  %v464_v59 = vld [vmem:[#allocation2 + $0x428] sm:$0xff] }
  0x60   : > { %v399_v63 = vld [vmem:[#allocation2 + $0x220] sm:$0xff]  ;;  %652 = vmatpush.msra.mxu2 %v459_v60  ;;  %v532_v60 = vld [vmem:[#allocation2 + $0x648] sm:$0xff] }
  0x61   : > { %v523_v0 = vld [vmem:[#allocation2 + $0x600] sm:$0xff]  ;;  %677 = vmatpush.msrb.mxu0 %v392_v61  ;;  %631 = vmatpush.msra.mxu1 %v399_v63  ;;  %v332_v61 = vld [vmem:[#allocation2 + $0x8] sm:$0xff] }
  0x62   : > { %717 = vmatpush.msrb.mxu2 %v520_v62  ;;  %v395_v4 = vld [vmem:[#allocation2 + $0x200] sm:$0xff]  ;;  %672 = vmatpush.msra.mxu3 %v523_v0  ;;  %v404_v62 = vld [vmem:[#allocation2 + $0x248] sm:$0xff] }
  0x63   : > { %678 = vmatpush.msrb.mxu0 %v388_v1  ;;  %632 = vmatpush.msra.mxu1 %v395_v4  ;;  %v2170_v38 = vld [vmem:[%s2164_s19] sm:$0xff]  ;;  %v460_v63 = vld [vmem:[#allocation2 + $0x408] sm:$0xff]  ;;  %v393_v1 = vld [vmem:[#allocation2 + $0x1f0] sm:$0xff]  ;;  %s1661_s19 = scalar_lea.sflag [#allocation4], %s319_s8 }
  0x64   : > { %718 = vmatpush.msrb.mxu2 %v516_v2  ;;  %737 = vmatpush.msrb.mxu3 %v584_v3  ;;  %v528_v0 = vld [vmem:[#allocation2 + $0x628] sm:$0xff]  ;;  %v521_v2 = vld [vmem:[#allocation2 + $0x5f0] sm:$0xff] }
  0x65   : > { %679 = vmatpush.msrb.mxu0 %v384_v5  ;;  %697 = vmatpush.msrb.mxu1 %v456_v6  ;;  %v400_v3 = vld [vmem:[#allocation2 + $0x228] sm:$0xff]  ;;  %v389_v5 = vld [vmem:[#allocation2 + $0x1d0] sm:$0xff] }
  0x66   : > { %719 = vmatpush.msrb.mxu2 %v512_v7  ;;  %738 = vmatpush.msrb.mxu3 %v580_v8  ;;  %v524_v4 = vld [vmem:[#allocation2 + $0x608] sm:$0xff]  ;;  %v517_v6 = vld [vmem:[#allocation2 + $0x5d0] sm:$0xff] }
  0x67   : > { %680 = vmatpush.msrb.mxu0 %v380_v9  ;;  %698 = vmatpush.msrb.mxu1 %v452_v10  ;;  %v585_v7 = vld [vmem:[#allocation2 + $0x7f0] sm:$0xff]  ;;  %v396_v8 = vld [vmem:[#allocation2 + $0x208] sm:$0xff] }
  0x68   : > { %720 = vmatpush.msrb.mxu2 %v508_v11  ;;  %739 = vmatpush.msrb.mxu3 %v576_v12  ;;  %v385_v9 = vld [vmem:[#allocation2 + $0x1b0] sm:$0xff] }
  0x69   : > { %681 = vmatpush.msrb.mxu0 %v376_v13  ;;  %699 = vmatpush.msrb.mxu1 %v448_v14  ;;  %v513_v10 = vld [vmem:[#allocation2 + $0x5b0] sm:$0xff] }
  0x6a   : > { %721 = vmatpush.msrb.mxu2 %v504_v15  ;;  %740 = vmatpush.msrb.mxu3 %v572_v16  ;;  %v457_v11 = vld [vmem:[#allocation2 + $0x3f0] sm:$0xff] }
  0x6b   : > { %682 = vmatpush.msrb.mxu0 %v372_v17  ;;  %700 = vmatpush.msrb.mxu1 %v444_v18  ;;  %v581_v12 = vld [vmem:[#allocation2 + $0x7d0] sm:$0xff] }
  0x6c   : > { %722 = vmatpush.msrb.mxu2 %v500_v19  ;;  %741 = vmatpush.msrb.mxu3 %v568_v20  ;;  %v381_v13 = vld [vmem:[#allocation2 + $0x190] sm:$0xff] }
  0x6d   : > { %683 = vmatpush.msrb.mxu0 %v368_v21  ;;  %701 = vmatpush.msrb.mxu1 %v440_v22  ;;  %v509_v14 = vld [vmem:[#allocation2 + $0x590] sm:$0xff] }
  0x6e   : > { %723 = vmatpush.msrb.mxu2 %v496_v23  ;;  %742 = vmatpush.msrb.mxu3 %v564_v24  ;;  %v453_v15 = vld [vmem:[#allocation2 + $0x3d0] sm:$0xff] }
  0x6f   : > { %684 = vmatpush.msrb.mxu0 %v364_v25  ;;  %702 = vmatpush.msrb.mxu1 %v436_v26  ;;  %v577_v16 = vld [vmem:[#allocation2 + $0x7b0] sm:$0xff] }
  0x70   : > { %724 = vmatpush.msrb.mxu2 %v492_v27  ;;  %743 = vmatpush.msrb.mxu3 %v560_v28  ;;  %v377_v17 = vld [vmem:[#allocation2 + $0x170] sm:$0xff] }
  0x71   : > { %685 = vmatpush.msrb.mxu0 %v360_v29  ;;  %703 = vmatpush.msrb.mxu1 %v432_v30  ;;  %v505_v18 = vld [vmem:[#allocation2 + $0x570] sm:$0xff] }
  0x72   : > { %725 = vmatpush.msrb.mxu2 %v488_v31  ;;  %744 = vmatpush.msrb.mxu3 %v556_v32  ;;  %v449_v19 = vld [vmem:[#allocation2 + $0x3b0] sm:$0xff] }
  0x73   : > { %653 = vmatmul.f32.vlgmr.msra.gmra.mxu2 %v2167_v33  ;;  %686 = vmatpush.msrb.mxu0 %v356_v34  ;;  %v573_v20 = vld [vmem:[#allocation2 + $0x790] sm:$0xff] }
  0x74   : > { %704 = vmatpush.msrb.mxu1 %v428_v35  ;;  %726 = vmatpush.msrb.mxu2 %v484_v36  ;;  %v373_v21 = vld [vmem:[#allocation2 + $0x150] sm:$0xff] }
  0x75   : > { %745 = vmatpush.msrb.mxu3 %v552_v37  ;;  %613 = vmatmul.f32.vlgmr.msra.gmra.mxu0 %v2170_v38  ;;  %v501_v22 = vld [vmem:[#allocation2 + $0x550] sm:$0xff] }
  0x76   : > { %673 = vmatmul.f32.vlgmr.msra.gmra.mxu3 %v2174_v39  ;;  %687 = vmatpush.msrb.mxu0 %v352_v40  ;;  %v445_v23 = vld [vmem:[#allocation2 + $0x390] sm:$0xff] }
  0x77   : > { %705 = vmatpush.msrb.mxu1 %v424_v41  ;;  %727 = vmatpush.msrb.mxu2 %v480_v42  ;;  %v569_v24 = vld [vmem:[#allocation2 + $0x770] sm:$0xff] }
  0x78   : > { %746 = vmatpush.msrb.mxu3 %v548_v43  ;;  %633 = vmatmul.f32.vlgmr.msra.gmra.mxu1 %v2178_v44  ;;  %v369_v25 = vld [vmem:[#allocation2 + $0x130] sm:$0xff] }
  0x79   : > { %688 = vmatpush.msrb.mxu0 %v348_v45  ;;  %706 = vmatpush.msrb.mxu1 %v420_v46  ;;  %v497_v26 = vld [vmem:[#allocation2 + $0x530] sm:$0xff] }
  0x7a   : > { %728 = vmatpush.msrb.mxu2 %v476_v47  ;;  %747 = vmatpush.msrb.mxu3 %v544_v48  ;;  %v441_v27 = vld [vmem:[#allocation2 + $0x370] sm:$0xff] }
  0x7b   : > { %689 = vmatpush.msrb.mxu0 %v344_v49  ;;  %707 = vmatpush.msrb.mxu1 %v416_v50  ;;  %v565_v28 = vld [vmem:[#allocation2 + $0x750] sm:$0xff] }
  0x7c   : > { %729 = vmatpush.msrb.mxu2 %v472_v51  ;;  %748 = vmatpush.msrb.mxu3 %v540_v52  ;;  %v365_v29 = vld [vmem:[#allocation2 + $0x110] sm:$0xff] }
  0x7d   : > { %690 = vmatpush.msrb.mxu0 %v340_v53  ;;  %708 = vmatpush.msrb.mxu1 %v412_v54  ;;  %v493_v30 = vld [vmem:[#allocation2 + $0x510] sm:$0xff] }
  0x7e   : > { %730 = vmatpush.msrb.mxu2 %v468_v55  ;;  %749 = vmatpush.msrb.mxu3 %v536_v56  ;;  %v437_v31 = vld [vmem:[#allocation2 + $0x350] sm:$0xff] }
  0x7f   : > { %691 = vmatpush.msrb.mxu0 %v336_v57  ;;  %709 = vmatpush.msrb.mxu1 %v408_v58  ;;  %v561_v32 = vld [vmem:[#allocation2 + $0x730] sm:$0xff] }
  0x80   : > { %731 = vmatpush.msrb.mxu2 %v464_v59  ;;  %750 = vmatpush.msrb.mxu3 %v532_v60  ;;  %v361_v34 = vld [vmem:[#allocation2 + $0xf0] sm:$0xff] }
  0x81   : > { %692 = vmatpush.msrb.mxu0 %v332_v61  ;;  %710 = vmatpush.msrb.mxu1 %v404_v62  ;;  %v489_v35 = vld [vmem:[#allocation2 + $0x4f0] sm:$0xff] }
  0x82   : > { %732 = vmatpush.msrb.mxu2 %v460_v63  ;;  %751 = vmatpush.msrb.mxu3 %v528_v0  ;;  %v433_v36 = vld [vmem:[#allocation2 + $0x330] sm:$0xff] }
  0x83   : > { %733 = vmatmul.f32.vlgmr.msrb.gmra.mxu2 %v2167_v33  ;;  %757 = vmatpush.msra.mxu0 %v393_v1  ;;  %v557_v37 = vld [vmem:[#allocation2 + $0x710] sm:$0xff] }
  0x84   : > { %797 = vmatpush.msra.mxu2 %v521_v2  ;;  %711 = vmatpush.msrb.mxu1 %v400_v3  ;;  %v357_v40 = vld [vmem:[#allocation2 + $0xd0] sm:$0xff] }
  0x85   : > { %752 = vmatpush.msrb.mxu3 %v524_v4  ;;  %693 = vmatmul.f32.vlgmr.msrb.gmra.mxu0 %v2170_v38  ;;  %v485_v41 = vld [vmem:[#allocation2 + $0x4d0] sm:$0xff] }
  0x86   : > { %753 = vmatmul.f32.vlgmr.msrb.gmra.mxu3 %v2174_v39  ;;  %758 = vmatpush.msra.mxu0 %v389_v5  ;;  %v429_v42 = vld [vmem:[#allocation2 + $0x310] sm:$0xff]  ;;  %v394_v5 = vld [vmem:[#allocation2 + $0x1f8] sm:$0xff] }
  0x87   : > { %798 = vmatpush.msra.mxu2 %v517_v6  ;;  %817 = vmatpush.msra.mxu3 %v585_v7  ;;  %v553_v43 = vld [vmem:[#allocation2 + $0x6f0] sm:$0xff]  ;;  %v522_v6 = vld [vmem:[#allocation2 + $0x5f8] sm:$0xff] }
  0x88   : > { %712 = vmatpush.msrb.mxu1 %v396_v8  ;;  %759 = vmatpush.msra.mxu0 %v385_v9  ;;  %v353_v45 = vld [vmem:[#allocation2 + $0xb0] sm:$0xff]  ;;  %v390_v9 = vld [vmem:[#allocation2 + $0x1d8] sm:$0xff] }
  0x89   : > { %713 = vmatmul.f32.vlgmr.msrb.gmra.mxu1 %v2178_v44  ;;  %799 = vmatpush.msra.mxu2 %v513_v10  ;;  %v481_v46 = vld [vmem:[#allocation2 + $0x4b0] sm:$0xff]  ;;  %v518_v10 = vld [vmem:[#allocation2 + $0x5d8] sm:$0xff] }
  0x8a   : > { %777 = vmatpush.msra.mxu1 %v457_v11  ;;  %818 = vmatpush.msra.mxu3 %v581_v12  ;;  %v425_v47 = vld [vmem:[#allocation2 + $0x2f0] sm:$0xff]  ;;  %v586_v11 = vld [vmem:[#allocation2 + $0x7f8] sm:$0xff] }
  0x8b   : > { %760 = vmatpush.msra.mxu0 %v381_v13  ;;  %800 = vmatpush.msra.mxu2 %v509_v14  ;;  %v549_v48 = vld [vmem:[#allocation2 + $0x6d0] sm:$0xff]  ;;  %v386_v13 = vld [vmem:[#allocation2 + $0x1b8] sm:$0xff] }
  0x8c   : > { %778 = vmatpush.msra.mxu1 %v453_v15  ;;  %819 = vmatpush.msra.mxu3 %v577_v16  ;;  %v349_v49 = vld [vmem:[#allocation2 + $0x90] sm:$0xff]  ;;  %v514_v14 = vld [vmem:[#allocation2 + $0x5b8] sm:$0xff] }
  0x8d   : > { %761 = vmatpush.msra.mxu0 %v377_v17  ;;  %801 = vmatpush.msra.mxu2 %v505_v18  ;;  %v477_v50 = vld [vmem:[#allocation2 + $0x490] sm:$0xff]  ;;  %v458_v15 = vld [vmem:[#allocation2 + $0x3f8] sm:$0xff] }
  0x8e   : > { %779 = vmatpush.msra.mxu1 %v449_v19  ;;  %820 = vmatpush.msra.mxu3 %v573_v20  ;;  %v421_v51 = vld [vmem:[#allocation2 + $0x2d0] sm:$0xff]  ;;  %v582_v16 = vld [vmem:[#allocation2 + $0x7d8] sm:$0xff] }
  0x8f   : > { %762 = vmatpush.msra.mxu0 %v373_v21  ;;  %802 = vmatpush.msra.mxu2 %v501_v22  ;;  %v545_v52 = vld [vmem:[#allocation2 + $0x6b0] sm:$0xff]  ;;  %v382_v17 = vld [vmem:[#allocation2 + $0x198] sm:$0xff] }
  0x90   : > { %780 = vmatpush.msra.mxu1 %v445_v23  ;;  %821 = vmatpush.msra.mxu3 %v569_v24  ;;  %v345_v53 = vld [vmem:[#allocation2 + $0x70] sm:$0xff]  ;;  %v510_v18 = vld [vmem:[#allocation2 + $0x598] sm:$0xff] }
  0x91   : > { %763 = vmatpush.msra.mxu0 %v369_v25  ;;  %803 = vmatpush.msra.mxu2 %v497_v26  ;;  %v473_v54 = vld [vmem:[#allocation2 + $0x470] sm:$0xff]  ;;  %v454_v19 = vld [vmem:[#allocation2 + $0x3d8] sm:$0xff] }
  0x92   : > { %781 = vmatpush.msra.mxu1 %v441_v27  ;;  %822 = vmatpush.msra.mxu3 %v565_v28  ;;  %v417_v55 = vld [vmem:[#allocation2 + $0x2b0] sm:$0xff]  ;;  %v578_v20 = vld [vmem:[#allocation2 + $0x7b8] sm:$0xff] }
  0x93   : > { %764 = vmatpush.msra.mxu0 %v365_v29  ;;  %804 = vmatpush.msra.mxu2 %v493_v30  ;;  %v541_v56 = vld [vmem:[#allocation2 + $0x690] sm:$0xff]  ;;  %v378_v21 = vld [vmem:[#allocation2 + $0x178] sm:$0xff] }
  0x94   : > { %782 = vmatpush.msra.mxu1 %v437_v31  ;;  %823 = vmatpush.msra.mxu3 %v561_v32  ;;  %v341_v57 = vld [vmem:[#allocation2 + $0x50] sm:$0xff]  ;;  %v506_v22 = vld [vmem:[#allocation2 + $0x578] sm:$0xff] }
  0x95   : > { %765 = vmatpush.msra.mxu0 %v361_v34  ;;  %805 = vmatpush.msra.mxu2 %v489_v35  ;;  %v469_v58 = vld [vmem:[#allocation2 + $0x450] sm:$0xff]  ;;  %v450_v23 = vld [vmem:[#allocation2 + $0x3b8] sm:$0xff] }
  0x96   : > { %783 = vmatpush.msra.mxu1 %v433_v36  ;;  %824 = vmatpush.msra.mxu3 %v557_v37  ;;  %v413_v59 = vld [vmem:[#allocation2 + $0x290] sm:$0xff]  ;;  %v574_v24 = vld [vmem:[#allocation2 + $0x798] sm:$0xff] }
  0x97   : > { %766 = vmatpush.msra.mxu0 %v357_v40  ;;  %806 = vmatpush.msra.mxu2 %v485_v41  ;;  %v537_v60 = vld [vmem:[#allocation2 + $0x670] sm:$0xff]  ;;  %v374_v25 = vld [vmem:[#allocation2 + $0x158] sm:$0xff] }
  0x98   : > { %784 = vmatpush.msra.mxu1 %v429_v42  ;;  %825 = vmatpush.msra.mxu3 %v553_v43  ;;  %v337_v61 = vld [vmem:[#allocation2 + $0x30] sm:$0xff]  ;;  %v502_v26 = vld [vmem:[#allocation2 + $0x558] sm:$0xff] }
  0x99   : > { %767 = vmatpush.msra.mxu0 %v353_v45  ;;  %807 = vmatpush.msra.mxu2 %v481_v46  ;;  %v465_v62 = vld [vmem:[#allocation2 + $0x430] sm:$0xff]  ;;  %v446_v27 = vld [vmem:[#allocation2 + $0x398] sm:$0xff] }
  0x9a   : > { %785 = vmatpush.msra.mxu1 %v425_v47  ;;  %826 = vmatpush.msra.mxu3 %v549_v48  ;;  %v409_v63 = vld [vmem:[#allocation2 + $0x270] sm:$0xff]  ;;  %v570_v28 = vld [vmem:[#allocation2 + $0x778] sm:$0xff] }
  0x9b   : > { %768 = vmatpush.msra.mxu0 %v349_v49  ;;  %808 = vmatpush.msra.mxu2 %v477_v50  ;;  %v533_v0 = vld [vmem:[#allocation2 + $0x650] sm:$0xff]  ;;  %v370_v29 = vld [vmem:[#allocation2 + $0x138] sm:$0xff] }
  0x9c   : > { %786 = vmatpush.msra.mxu1 %v421_v51  ;;  %827 = vmatpush.msra.mxu3 %v545_v52  ;;  %v333_v1 = vld [vmem:[#allocation2 + $0x10] sm:$0xff]  ;;  %v498_v30 = vld [vmem:[#allocation2 + $0x538] sm:$0xff] }
  0x9d   : > { %769 = vmatpush.msra.mxu0 %v345_v53  ;;  %809 = vmatpush.msra.mxu2 %v473_v54  ;;  %v461_v2 = vld [vmem:[#allocation2 + $0x410] sm:$0xff]  ;;  %v442_v31 = vld [vmem:[#allocation2 + $0x378] sm:$0xff] }
  0x9e   : > { %787 = vmatpush.msra.mxu1 %v417_v55  ;;  %828 = vmatpush.msra.mxu3 %v541_v56  ;;  %v405_v3 = vld [vmem:[#allocation2 + $0x250] sm:$0xff]  ;;  %v566_v32 = vld [vmem:[#allocation2 + $0x758] sm:$0xff] }
  0x9f   : > { %770 = vmatpush.msra.mxu0 %v341_v57  ;;  %810 = vmatpush.msra.mxu2 %v469_v58  ;;  %v529_v4 = vld [vmem:[#allocation2 + $0x630] sm:$0xff]  ;;  %v366_v34 = vld [vmem:[#allocation2 + $0x118] sm:$0xff] }
  0xa0   : > { %788 = vmatpush.msra.mxu1 %v413_v59  ;;  %829 = vmatpush.msra.mxu3 %v537_v60  ;;  %v401_v7 = vld [vmem:[#allocation2 + $0x230] sm:$0xff]  ;;  %v494_v35 = vld [vmem:[#allocation2 + $0x518] sm:$0xff] }
  0xa1   : > { %771 = vmatpush.msra.mxu0 %v337_v61  ;;  %811 = vmatpush.msra.mxu2 %v465_v62  ;;  %v525_v8 = vld [vmem:[#allocation2 + $0x610] sm:$0xff]  ;;  %v438_v36 = vld [vmem:[#allocation2 + $0x358] sm:$0xff] }
  0xa2   : > { %789 = vmatpush.msra.mxu1 %v409_v63  ;;  %830 = vmatpush.msra.mxu3 %v533_v0  ;;  %v397_v12 = vld [vmem:[#allocation2 + $0x210] sm:$0xff]  ;;  %v562_v37 = vld [vmem:[#allocation2 + $0x738] sm:$0xff] }
  0xa3   : > { %772 = vmatpush.msra.mxu0 %v333_v1  ;;  %812 = vmatpush.msra.mxu2 %v461_v2  ;;  %v362_v40 = vld [vmem:[#allocation2 + $0xf8] sm:$0xff] }
  0xa4   : > { %790 = vmatpush.msra.mxu1 %v405_v3  ;;  %831 = vmatpush.msra.mxu3 %v529_v4  ;;  %v490_v41 = vld [vmem:[#allocation2 + $0x4f8] sm:$0xff] }
  0xa5   : > { %813 = vmatmul.f32.vlgmr.msra.gmra.mxu2 %v2167_v33  ;;  %837 = vmatpush.msrb.mxu0 %v394_v5  ;;  %v434_v42 = vld [vmem:[#allocation2 + $0x338] sm:$0xff] }
  0xa6   : > { %877 = vmatpush.msrb.mxu2 %v522_v6  ;;  %791 = vmatpush.msra.mxu1 %v401_v7  ;;  %v558_v43 = vld [vmem:[#allocation2 + $0x718] sm:$0xff] }
  0xa7   : > { %832 = vmatpush.msra.mxu3 %v525_v8  ;;  %773 = vmatmul.f32.vlgmr.msra.gmra.mxu0 %v2170_v38  ;;  %v358_v45 = vld [vmem:[#allocation2 + $0xd8] sm:$0xff] }
  0xa8   : > { %833 = vmatmul.f32.vlgmr.msra.gmra.mxu3 %v2174_v39  ;;  %838 = vmatpush.msrb.mxu0 %v390_v9  ;;  %v486_v46 = vld [vmem:[#allocation2 + $0x4d8] sm:$0xff]  ;;  %v981_v9 = vld [vmem:[#allocation5 + $0x1e0] sm:$0xff] }
  0xa9   : > { %878 = vmatpush.msrb.mxu2 %v518_v10  ;;  %897 = vmatpush.msrb.mxu3 %v586_v11  ;;  %v430_v47 = vld [vmem:[#allocation2 + $0x318] sm:$0xff] }
  0xaa   : > { %792 = vmatpush.msra.mxu1 %v397_v12  ;;  %839 = vmatpush.msrb.mxu0 %v386_v13  ;;  %v554_v48 = vld [vmem:[#allocation2 + $0x6f8] sm:$0xff]  ;;  %v977_v12 = vld [vmem:[#allocation5 + $0x1c0] sm:$0xff] }
  0xab   : > { %793 = vmatmul.f32.vlgmr.msra.gmra.mxu1 %v2178_v44  ;;  %879 = vmatpush.msrb.mxu2 %v514_v14  ;;  %v354_v49 = vld [vmem:[#allocation2 + $0xb8] sm:$0xff]  ;;  %v973_v14 = vld [vmem:[#allocation5 + $0x1a0] sm:$0xff] }
  0xac   : > { %857 = vmatpush.msrb.mxu1 %v458_v15  ;;  %898 = vmatpush.msrb.mxu3 %v582_v16  ;;  %v482_v50 = vld [vmem:[#allocation2 + $0x4b8] sm:$0xff]  ;;  %v1045_v15 = vld [vmem:[#allocation5 + $0x3e0] sm:$0xff] }
  0xad   : > { %840 = vmatpush.msrb.mxu0 %v382_v17  ;;  %880 = vmatpush.msrb.mxu2 %v510_v18  ;;  %v426_v51 = vld [vmem:[#allocation2 + $0x2f8] sm:$0xff]  ;;  %v969_v16 = vld [vmem:[#allocation5 + $0x180] sm:$0xff] }
  0xae   : > { %858 = vmatpush.msrb.mxu1 %v454_v19  ;;  %899 = vmatpush.msrb.mxu3 %v578_v20  ;;  %v550_v52 = vld [vmem:[#allocation2 + $0x6d8] sm:$0xff]  ;;  %v1041_v17 = vld [vmem:[#allocation5 + $0x3c0] sm:$0xff] }
  0xaf   : > { %841 = vmatpush.msrb.mxu0 %v378_v21  ;;  %881 = vmatpush.msrb.mxu2 %v506_v22  ;;  %v350_v53 = vld [vmem:[#allocation2 + $0x98] sm:$0xff]  ;;  %v1037_v18 = vld [vmem:[#allocation5 + $0x3a0] sm:$0xff] }
  0xb0   : > { %859 = vmatpush.msrb.mxu1 %v450_v23  ;;  %900 = vmatpush.msrb.mxu3 %v574_v24  ;;  %v478_v54 = vld [vmem:[#allocation2 + $0x498] sm:$0xff]  ;;  %v961_v19 = vld [vmem:[#allocation5 + $0x140] sm:$0xff] }
  0xb1   : > { %842 = vmatpush.msrb.mxu0 %v374_v25  ;;  %882 = vmatpush.msrb.mxu2 %v502_v26  ;;  %v422_v55 = vld [vmem:[#allocation2 + $0x2d8] sm:$0xff]  ;;  %v1033_v20 = vld [vmem:[#allocation5 + $0x380] sm:$0xff] }
  0xb2   : > { %860 = vmatpush.msrb.mxu1 %v446_v27  ;;  %901 = vmatpush.msrb.mxu3 %v570_v28  ;;  %v546_v56 = vld [vmem:[#allocation2 + $0x6b8] sm:$0xff]  ;;  %v953_v21 = vld [vmem:[#allocation5 + $0x100] sm:$0xff] }
  0xb3   : > { %843 = vmatpush.msrb.mxu0 %v370_v29  ;;  %883 = vmatpush.msrb.mxu2 %v498_v30  ;;  %v346_v57 = vld [vmem:[#allocation2 + $0x78] sm:$0xff]  ;;  %v1025_v22 = vld [vmem:[#allocation5 + $0x340] sm:$0xff] }
  0xb4   : > { %861 = vmatpush.msrb.mxu1 %v442_v31  ;;  %902 = vmatpush.msrb.mxu3 %v566_v32  ;;  %v474_v58 = vld [vmem:[#allocation2 + $0x478] sm:$0xff]  ;;  %v1109_v23 = vld [vmem:[#allocation5 + $0x5e0] sm:$0xff] }
  0xb5   : > { %844 = vmatpush.msrb.mxu0 %v366_v34  ;;  %884 = vmatpush.msrb.mxu2 %v494_v35  ;;  %v418_v59 = vld [vmem:[#allocation2 + $0x2b8] sm:$0xff]  ;;  %v1021_v24 = vld [vmem:[#allocation5 + $0x320] sm:$0xff] }
  0xb6   : > { %862 = vmatpush.msrb.mxu1 %v438_v36  ;;  %903 = vmatpush.msrb.mxu3 %v562_v37  ;;  %v542_v60 = vld [vmem:[#allocation2 + $0x698] sm:$0xff]  ;;  %v1105_v25 = vld [vmem:[#allocation5 + $0x5c0] sm:$0xff] }
  0xb7   : > { %845 = vmatpush.msrb.mxu0 %v362_v40  ;;  %885 = vmatpush.msrb.mxu2 %v490_v41  ;;  %v342_v61 = vld [vmem:[#allocation2 + $0x58] sm:$0xff]  ;;  %v945_v26 = vld [vmem:[#allocation5 + $0xc0] sm:$0xff] }
  0xb8   : > { %863 = vmatpush.msrb.mxu1 %v434_v42  ;;  %904 = vmatpush.msrb.mxu3 %v558_v43  ;;  %v470_v62 = vld [vmem:[#allocation2 + $0x458] sm:$0xff]  ;;  %v1017_v27 = vld [vmem:[#allocation5 + $0x300] sm:$0xff] }
  0xb9   : > { %846 = vmatpush.msrb.mxu0 %v358_v45  ;;  %886 = vmatpush.msrb.mxu2 %v486_v46  ;;  %v414_v63 = vld [vmem:[#allocation2 + $0x298] sm:$0xff]  ;;  %v1101_v28 = vld [vmem:[#allocation5 + $0x5a0] sm:$0xff] }
  0xba   : > { %864 = vmatpush.msrb.mxu1 %v430_v47  ;;  %905 = vmatpush.msrb.mxu3 %v554_v48  ;;  %v538_v0 = vld [vmem:[#allocation2 + $0x678] sm:$0xff]  ;;  %v941_v29 = vld [vmem:[#allocation5 + $0xa0] sm:$0xff] }
  0xbb   : > { %847 = vmatpush.msrb.mxu0 %v354_v49  ;;  %887 = vmatpush.msrb.mxu2 %v482_v50  ;;  %v338_v1 = vld [vmem:[#allocation2 + $0x38] sm:$0xff]  ;;  %v1013_v30 = vld [vmem:[#allocation5 + $0x2e0] sm:$0xff] }
  0xbc   : > { %865 = vmatpush.msrb.mxu1 %v426_v51  ;;  %906 = vmatpush.msrb.mxu3 %v550_v52  ;;  %v466_v2 = vld [vmem:[#allocation2 + $0x438] sm:$0xff]  ;;  %v1097_v31 = vld [vmem:[#allocation5 + $0x580] sm:$0xff]  ;;  %v982_v51 = vld [vmem:[#allocation5 + $0x1e8] sm:$0xff] }
  0xbd   : > { %848 = vmatpush.msrb.mxu0 %v350_v53  ;;  %888 = vmatpush.msrb.mxu2 %v478_v54  ;;  %v410_v3 = vld [vmem:[#allocation2 + $0x278] sm:$0xff]  ;;  %v937_v32 = vld [vmem:[#allocation5 + $0x80] sm:$0xff]  ;;  %v978_v53 = vld [vmem:[#allocation5 + $0x1c8] sm:$0xff] }
  0xbe   : > { %866 = vmatpush.msrb.mxu1 %v422_v55  ;;  %907 = vmatpush.msrb.mxu3 %v546_v56  ;;  %v534_v4 = vld [vmem:[#allocation2 + $0x658] sm:$0xff]  ;;  %v1009_v34 = vld [vmem:[#allocation5 + $0x2c0] sm:$0xff]  ;;  %v974_v56 = vld [vmem:[#allocation5 + $0x1a8] sm:$0xff] }
  0xbf   : > { %849 = vmatpush.msrb.mxu0 %v346_v57  ;;  %889 = vmatpush.msrb.mxu2 %v474_v58  ;;  %v334_v5 = vld [vmem:[#allocation2 + $0x18] sm:$0xff]  ;;  %v1093_v35 = vld [vmem:[#allocation5 + $0x560] sm:$0xff]  ;;  %v1046_v57 = vld [vmem:[#allocation5 + $0x3e8] sm:$0xff] }
  0xc0   : > { %867 = vmatpush.msrb.mxu1 %v418_v59  ;;  %908 = vmatpush.msrb.mxu3 %v542_v60  ;;  %v462_v6 = vld [vmem:[#allocation2 + $0x418] sm:$0xff]  ;;  %v933_v36 = vld [vmem:[#allocation5 + $0x60] sm:$0xff]  ;;  %v970_v59 = vld [vmem:[#allocation5 + $0x188] sm:$0xff] }
  0xc1   : > { %850 = vmatpush.msrb.mxu0 %v342_v61  ;;  %890 = vmatpush.msrb.mxu2 %v470_v62  ;;  %v406_v7 = vld [vmem:[#allocation2 + $0x258] sm:$0xff]  ;;  %v1005_v37 = vld [vmem:[#allocation5 + $0x2a0] sm:$0xff]  ;;  %v1042_v60 = vld [vmem:[#allocation5 + $0x3c8] sm:$0xff] }
  0xc2   : > { %868 = vmatpush.msrb.mxu1 %v414_v63  ;;  %909 = vmatpush.msrb.mxu3 %v538_v0  ;;  %v530_v8 = vld [vmem:[#allocation2 + $0x638] sm:$0xff]  ;;  %v1089_v40 = vld [vmem:[#allocation5 + $0x540] sm:$0xff]  ;;  %v966_v62 = vld [vmem:[#allocation5 + $0x168] sm:$0xff] }
  0xc3   : > { %851 = vmatpush.msrb.mxu0 %v338_v1  ;;  %891 = vmatpush.msrb.mxu2 %v466_v2  ;;  %v402_v10 = vld [vmem:[#allocation2 + $0x238] sm:$0xff]  ;;  %v929_v41 = vld [vmem:[#allocation5 + $0x40] sm:$0xff]  ;;  %v1038_v63 = vld [vmem:[#allocation5 + $0x3a8] sm:$0xff] }
  0xc4   : > { %869 = vmatpush.msrb.mxu1 %v410_v3  ;;  %910 = vmatpush.msrb.mxu3 %v534_v4  ;;  %v526_v11 = vld [vmem:[#allocation2 + $0x618] sm:$0xff]  ;;  %v1001_v42 = vld [vmem:[#allocation5 + $0x280] sm:$0xff]  ;;  %v962_v2 = vld [vmem:[#allocation5 + $0x148] sm:$0xff] }
  0xc5   : > { %852 = vmatpush.msrb.mxu0 %v334_v5  ;;  %892 = vmatpush.msrb.mxu2 %v462_v6  ;;  %v398_v13 = vld [vmem:[#allocation2 + $0x218] sm:$0xff]  ;;  %v1085_v43 = vld [vmem:[#allocation5 + $0x520] sm:$0xff]  ;;  %v1034_v3 = vld [vmem:[#allocation5 + $0x388] sm:$0xff] }
  0xc6   : > { %870 = vmatpush.msrb.mxu1 %v406_v7  ;;  %911 = vmatpush.msrb.mxu3 %v530_v8  ;;  %v925_v45 = vld [vmem:[#allocation5 + $0x20] sm:$0xff]  ;;  %v958_v6 = vld [vmem:[#allocation5 + $0x128] sm:$0xff] }
  0xc7   : > { %893 = vmatmul.f32.vlgmr.msrb.gmra.mxu2 %v2167_v33  ;;  %1187 = vmatpush.msra.mxu0 %v981_v9  ;;  %v965_v33 = vld [vmem:[#allocation5 + $0x160] sm:$0xff]  ;;  %v1030_v7 = vld [vmem:[#allocation5 + $0x368] sm:$0xff] }
  0xc8   : > { %871 = vmatpush.msrb.mxu1 %v402_v10  ;;  %912 = vmatpush.msrb.mxu3 %v526_v11  ;;  %v997_v46 = vld [vmem:[#allocation5 + $0x260] sm:$0xff]  ;;  %v954_v9 = vld [vmem:[#allocation5 + $0x108] sm:$0xff] }
  0xc9   : > { %853 = vmatmul.f32.vlgmr.msrb.gmra.mxu0 %v2170_v38  ;;  %913 = vmatmul.f32.vlgmr.msrb.gmra.mxu3 %v2174_v39  ;;  %v957_v38 = vld [vmem:[#allocation5 + $0x120] sm:$0xff]  ;;  %v1026_v11 = vld [vmem:[#allocation5 + $0x348] sm:$0xff] }
  0xca   : > { %1188 = vmatpush.msra.mxu0 %v977_v12  ;;  %872 = vmatpush.msrb.mxu1 %v398_v13  ;;  %v1029_v39 = vld [vmem:[#allocation5 + $0x360] sm:$0xff] }
  0xcb   : > { %873 = vmatmul.f32.vlgmr.msrb.gmra.mxu1 %v2178_v44  ;;  %v949_v44 = vld [vmem:[#allocation5 + $0xe0] sm:$0xff]  ;;  %1227 = vmatpush.msra.mxu2 %v1109_v23  ;;  %v1102_v23 = vld [vmem:[#allocation5 + $0x5a8] sm:$0xff] }
  0xcc   : > { %1189 = vmatpush.msra.mxu0 %v973_v14  ;;  %1207 = vmatpush.msra.mxu1 %v1045_v15  ;;  %v1081_v47 = vld [vmem:[#allocation5 + $0x500] sm:$0xff]  ;;  %v1110_v15 = vld [vmem:[#allocation5 + $0x5e8] sm:$0xff] }
  0xcd   : > { %1228 = vmatpush.msra.mxu2 %v1105_v25  ;;  %v921_v48 = vld [vmem:[#allocation5] sm:$0xff]  ;;  %v1014_v25 = vld [vmem:[#allocation5 + $0x2e8] sm:$0xff] }
  0xce   : > { %1190 = vmatpush.msra.mxu0 %v969_v16  ;;  %1208 = vmatpush.msra.mxu1 %v1041_v17  ;;  %v993_v49 = vld [vmem:[#allocation5 + $0x240] sm:$0xff]  ;;  %v950_v16 = vld [vmem:[#allocation5 + $0xe8] sm:$0xff] }
  0xcf   : > { %1229 = vmatpush.msra.mxu2 %v1101_v28  ;;  %v1077_v50 = vld [vmem:[#allocation5 + $0x4e0] sm:$0xff]  ;;  %v1022_v17 = vld [vmem:[#allocation5 + $0x328] sm:$0xff] }
  0xd0   : > { %1191 = vmatpush.msra.mxu0 %v965_v33  ;;  %1209 = vmatpush.msra.mxu1 %v1037_v18  ;;  %v989_v52 = vld [vmem:[#allocation5 + $0x220] sm:$0xff]  ;;  %v1098_v28 = vld [vmem:[#allocation5 + $0x588] sm:$0xff] }
  0xd1   : > { %1230 = vmatpush.msra.mxu2 %v1097_v31  ;;  %v1073_v54 = vld [vmem:[#allocation5 + $0x4c0] sm:$0xff]  ;;  %v1010_v31 = vld [vmem:[#allocation5 + $0x2c8] sm:$0xff] }
  0xd2   : > { %1192 = vmatpush.msra.mxu0 %v961_v19  ;;  %1210 = vmatpush.msra.mxu1 %v1033_v20  ;;  %v985_v55 = vld [vmem:[#allocation5 + $0x200] sm:$0xff]  ;;  %v1106_v19 = vld [vmem:[#allocation5 + $0x5c8] sm:$0xff] }
  0xd3   : > { %1231 = vmatpush.msra.mxu2 %v1093_v35  ;;  %v1069_v58 = vld [vmem:[#allocation5 + $0x4a0] sm:$0xff]  ;;  %v946_v20 = vld [vmem:[#allocation5 + $0xc8] sm:$0xff] }
  0xd4   : > { %1193 = vmatpush.msra.mxu0 %v957_v38  ;;  %1211 = vmatpush.msra.mxu1 %v1029_v39  ;;  %v1065_v61 = vld [vmem:[#allocation5 + $0x480] sm:$0xff]  ;;  %v934_v35 = vld [vmem:[#allocation5 + $0x68] sm:$0xff] }
  0xd5   : > { %1232 = vmatpush.msra.mxu2 %v1089_v40  ;;  %v2197_v0 = vld [vmem:[%s2273_s2] sm:$0xf] }
  0xd6   : > { %1194 = vmatpush.msra.mxu0 %v953_v21  ;;  %1212 = vmatpush.msra.mxu1 %v1025_v22  ;;  %v1061_v1 = vld [vmem:[#allocation5 + $0x460] sm:$0xff]  ;;  %v589_v5 = vperm.slane %v2197_v0, 0  ;;  %v1018_v21 = vld [vmem:[#allocation5 + $0x308] sm:$0xff] }
  0xd7   : > { %1233 = vmatpush.msra.mxu2 %v1085_v43  ;;  %v1057_v4 = vld [vmem:[#allocation5 + $0x440] sm:$0xff]  ;;  %v1002_v43 = vld [vmem:[#allocation5 + $0x288] sm:$0xff] }
  0xd8   : > { %1195 = vmatpush.msra.mxu0 %v949_v44  ;;  %1213 = vmatpush.msra.mxu1 %v1021_v24  ;;  %v1053_v8 = vld [vmem:[#allocation5 + $0x420] sm:$0xff]  ;;  %v942_v44 = vld [vmem:[#allocation5 + $0xa8] sm:$0xff] }
  0xd9   : > { %1234 = vmatpush.msra.mxu2 %v1081_v47  ;;  %v1049_v12 = vld [vmem:[#allocation5 + $0x400] sm:$0xff]  ;;  %v1086_v47 = vld [vmem:[#allocation5 + $0x528] sm:$0xff] }
  0xda   : > { %1196 = vmatpush.msra.mxu0 %v945_v26  ;;  %1214 = vmatpush.msra.mxu1 %v1017_v27  ;;  %v1173_v13 = vld [vmem:[#allocation5 + $0x7e0] sm:$0xff] }
  0xdb   : > { %1235 = vmatpush.msra.mxu2 %v1077_v50  ;;  %1247 = vmatpush.msra.mxu3 %v1173_v13  ;;  %v1169_v33 = vld [vmem:[#allocation5 + $0x7c0] sm:$0xff]  ;;  %v1066_v13 = vld [vmem:[#allocation5 + $0x488] sm:$0xff] }
  0xdc   : > { %1197 = vmatpush.msra.mxu0 %v941_v29  ;;  %1215 = vmatpush.msra.mxu1 %v1013_v30  ;;  %v1165_v22 = vld [vmem:[#allocation5 + $0x7a0] sm:$0xff]  ;;  %v938_v29 = vld [vmem:[#allocation5 + $0x88] sm:$0xff] }
  0xdd   : > { %1236 = vmatpush.msra.mxu2 %v1073_v54  ;;  %1248 = vmatpush.msra.mxu3 %v1169_v33  ;;  %v1161_v26 = vld [vmem:[#allocation5 + $0x780] sm:$0xff]  ;;  %v994_v54 = vld [vmem:[#allocation5 + $0x248] sm:$0xff] }
  0xde   : > { %1198 = vmatpush.msra.mxu0 %v937_v32  ;;  %1216 = vmatpush.msra.mxu1 %v1009_v34  ;;  %v1157_v32 = vld [vmem:[#allocation5 + $0x760] sm:$0xff]  ;;  %v1094_v34 = vld [vmem:[#allocation5 + $0x568] sm:$0xff] }
  0xdf   : > { %1237 = vmatpush.msra.mxu2 %v1069_v58  ;;  %1249 = vmatpush.msra.mxu3 %v1165_v22  ;;  %v1153_v40 = vld [vmem:[#allocation5 + $0x740] sm:$0xff]  ;;  %v990_v58 = vld [vmem:[#allocation5 + $0x228] sm:$0xff]  ;;  %v1039_v22 = vld [vmem:[#allocation5 + $0x3b0] sm:$0xff] }
  0xe0   : > { %1199 = vmatpush.msra.mxu0 %v933_v36  ;;  %1217 = vmatpush.msra.mxu1 %v1005_v37  ;;  %v1006_v37 = vld [vmem:[#allocation5 + $0x2a8] sm:$0xff]  ;;  %v1145_v50 = vld [vmem:[#allocation5 + $0x700] sm:$0xff] }
  0xe1   : > { %1238 = vmatpush.msra.mxu2 %v1065_v61  ;;  %1250 = vmatpush.msra.mxu3 %v1161_v26  ;;  %v1062_v33 = vld [vmem:[#allocation5 + $0x468] sm:$0xff] }
  0xe2   : > { %1200 = vmatpush.msra.mxu0 %v929_v41  ;;  %1218 = vmatpush.msra.mxu1 %v1001_v42  ;;  %v1090_v41 = vld [vmem:[#allocation5 + $0x548] sm:$0xff] }
  0xe3   : > { %1239 = vmatpush.msra.mxu2 %v1061_v1  ;;  %1251 = vmatpush.msra.mxu3 %v1157_v32  ;;  %v930_v42 = vld [vmem:[#allocation5 + $0x48] sm:$0xff]  ;;  %v1137_v1 = vld [vmem:[#allocation5 + $0x6c0] sm:$0xff] }
  0xe4   : > { %1201 = vmatpush.msra.mxu0 %v925_v45  ;;  %1219 = vmatpush.msra.mxu1 %v997_v46  ;;  %v590_v45 = vperm.slane %v2197_v0, 1  ;;  %v1149_v46 = vld [vmem:[#allocation5 + $0x720] sm:$0xff]  ;;  %v1050_v26 = vld [vmem:[#allocation5 + $0x408] sm:$0xff] }
  0xe5   : > { %1240 = vmatpush.msra.mxu2 %v1057_v4  ;;  %1252 = vmatpush.msra.mxu3 %v1153_v40  ;;  %v1074_v4 = vld [vmem:[#allocation5 + $0x4c8] sm:$0xff]  ;;  %v935_v40 = vld [vmem:[#allocation5 + $0x70] sm:$0xff] }
  0xe6   : > { %1202 = vmatpush.msra.mxu0 %v921_v48  ;;  %1220 = vmatpush.msra.mxu1 %v993_v49  ;;  %v926_v48 = vld [vmem:[#allocation5 + $0x28] sm:$0xff] }
  0xe7   : > { %1241 = vmatpush.msra.mxu2 %v1053_v8  ;;  %v998_v49 = vld [vmem:[#allocation5 + $0x268] sm:$0xff]  ;;  %1253 = vmatpush.msra.mxu3 %v1149_v46 }
  0xe8   : > { %1267 = vmatpush.msrb.mxu0 %v982_v51  ;;  %1221 = vmatpush.msra.mxu1 %v989_v52  ;;  %v1082_v51 = vld [vmem:[#allocation5 + $0x508] sm:$0xff] }
  0xe9   : > { %1242 = vmatpush.msra.mxu2 %v1049_v12  ;;  %v922_v52 = vld [vmem:[#allocation5 + $0x8] sm:$0xff]  ;;  %1254 = vmatpush.msra.mxu3 %v1145_v50  ;;  %v923_v50 = vld [vmem:[#allocation5 + $0x10] sm:$0xff] }
  0xea   : > { %1268 = vmatpush.msrb.mxu0 %v978_v53  ;;  %1222 = vmatpush.msra.mxu1 %v985_v55  ;;  %v983_v55 = vld [vmem:[#allocation5 + $0x1f0] sm:$0xff]  ;;  %v1170_v32 = vld [vmem:[#allocation5 + $0x7c8] sm:$0xff] }
  0xeb   : > { %1307 = vmatpush.msrb.mxu2 %v1110_v15  ;;  %v1158_v46 = vld [vmem:[#allocation5 + $0x768] sm:$0xff] }
  0xec   : > { %1269 = vmatpush.msrb.mxu0 %v974_v56  ;;  %1287 = vmatpush.msrb.mxu1 %v1046_v57  ;;  %v1141_v57 = vld [vmem:[#allocation5 + $0x6e0] sm:$0xff] }
  0xed   : > { %1308 = vmatpush.msrb.mxu2 %v1106_v19  ;;  %1255 = vmatpush.msra.mxu3 %v1141_v57  ;;  %v959_v19 = vld [vmem:[#allocation5 + $0x130] sm:$0xff]  ;;  %v1146_v57 = vld [vmem:[#allocation5 + $0x708] sm:$0xff] }
  0xee   : > { %1270 = vmatpush.msrb.mxu0 %v970_v59  ;;  %1288 = vmatpush.msrb.mxu1 %v1042_v60  ;;  %v979_v59 = vld [vmem:[#allocation5 + $0x1d0] sm:$0xff]  ;;  %v1078_v60 = vld [vmem:[#allocation5 + $0x4e8] sm:$0xff] }
  0xef   : > { %1309 = vmatpush.msrb.mxu2 %v1102_v23  ;;  %1256 = vmatpush.msra.mxu3 %v1137_v1  ;;  %v1054_v23 = vld [vmem:[#allocation5 + $0x428] sm:$0xff] }
  0xf0   : > { %1271 = vmatpush.msrb.mxu0 %v966_v62  ;;  %1289 = vmatpush.msrb.mxu1 %v1038_v63  ;;  %v986_v63 = vld [vmem:[#allocation5 + $0x208] sm:$0xff] }
  0xf1   : > { %1310 = vmatpush.msrb.mxu2 %v1098_v28  ;;  %v1031_v28 = vld [vmem:[#allocation5 + $0x370] sm:$0xff] }
  0xf2   : > { %1272 = vmatpush.msrb.mxu0 %v962_v2  ;;  %1290 = vmatpush.msrb.mxu1 %v1034_v3  ;;  %v614_v10 = vpop.f32.mrf.mxu0  ;;  %v975_v2 = vld [vmem:[#allocation5 + $0x1b0] sm:$0xff] }
  0xf3   : > { %v615_v14 = vadd.f32 %v614_v10, %v589_v5  ;;  %1311 = vmatpush.msrb.mxu2 %v1094_v34  ;;  %v1133_v5 = vld [vmem:[#allocation5 + $0x6a0] sm:$0xff]  ;;  %v939_v34 = vld [vmem:[#allocation5 + $0x90] sm:$0xff] }
  0xf4   : > { %1273 = vmatpush.msrb.mxu0 %v958_v6  ;;  %1291 = vmatpush.msrb.mxu1 %v1030_v7  ;;  %v971_v6 = vld [vmem:[#allocation5 + $0x190] sm:$0xff]  ;;  %v1129_v10 = vld [vmem:[#allocation5 + $0x680] sm:$0xff] }
  0xf5   : > { %v634_v18 = vpop.f32.mrf.mxu1  ;;  %1312 = vmatpush.msrb.mxu2 %v1090_v41  ;;  %1257 = vmatpush.msra.mxu3 %v1133_v5  ;;  %v1019_v41 = vld [vmem:[#allocation5 + $0x310] sm:$0xff]  ;;  %v972_v5 = vld [vmem:[#allocation5 + $0x198] sm:$0xff] }
  0xf6   : > { %1274 = vmatpush.msrb.mxu0 %v954_v9  ;;  %1292 = vmatpush.msrb.mxu1 %v1026_v11  ;;  %v635_v38 = vadd.f32 %v634_v18, %v615_v14  ;;  %v654_v39 = vpop.f32.mrf.mxu2  ;;  %v1070_v9 = vld [vmem:[#allocation5 + $0x4a8] sm:$0xff]  ;;  %v967_v11 = vld [vmem:[#allocation5 + $0x170] sm:$0xff]  ;;  %v1125_v14 = vld [vmem:[#allocation5 + $0x660] sm:$0xff] }
  0xf7   : > { %1313 = vmatpush.msrb.mxu2 %v1086_v47  ;;  %1258 = vmatpush.msra.mxu3 %v1129_v10  ;;  %v1121_v18 = vld [vmem:[#allocation5 + $0x640] sm:$0xff]  ;;  %v927_v47 = vld [vmem:[#allocation5 + $0x30] sm:$0xff] }
  0xf8   : > { %1275 = vmatpush.msrb.mxu0 %v950_v16  ;;  %1293 = vmatpush.msrb.mxu1 %v1022_v17  ;;  %v655_v24 = vadd.f32 %v654_v39, %v635_v38  ;;  %v963_v16 = vld [vmem:[#allocation5 + $0x150] sm:$0xff]  ;;  %v1058_v38 = vld [vmem:[#allocation5 + $0x448] sm:$0xff]  ;;  %v1117_v39 = vld [vmem:[#allocation5 + $0x620] sm:$0xff] }
  0xf9   : > { %v674_v27 = vpop.f32.mrf.mxu3  ;;  %1314 = vmatpush.msrb.mxu2 %v1082_v51  ;;  %v1047_v17 = vld [vmem:[#allocation5 + $0x3f0] sm:$0xff]  ;;  %1259 = vmatpush.msra.mxu3 %v1125_v14  ;;  %v591_v51 = vperm.slane %v2197_v0, 2  ;;  %v964_v14 = vld [vmem:[#allocation5 + $0x158] sm:$0xff] }
  0xfa   : > { %1276 = vmatpush.msrb.mxu0 %v946_v20  ;;  %1294 = vmatpush.msrb.mxu1 %v1018_v21  ;;  %v675_v30 = vadd.f32 %v674_v27, %v655_v24  ;;  %v1043_v20 = vld [vmem:[#allocation5 + $0x3d0] sm:$0xff] }
  0xfb   : > { %1315 = vmatpush.msrb.mxu2 %v1078_v60  ;;  %v955_v21 = vld [vmem:[#allocation5 + $0x110] sm:$0xff]  ;;  %1260 = vmatpush.msra.mxu3 %v1121_v18  ;;  %v960_v18 = vld [vmem:[#allocation5 + $0x138] sm:$0xff] }
  0xfc   : > { %1277 = vmatpush.msrb.mxu0 %v942_v44  ;;  %1295 = vmatpush.msrb.mxu1 %v1014_v25  ;;  %v2200_v36 = vmax.f32 %v675_v30, 0.0  ;;  %v1113_v44 = vld [vmem:[#allocation5 + $0x600] sm:$0xff]  ;;  %v951_v24 = vld [vmem:[#allocation5 + $0xf0] sm:$0xff] }
  0xfd   : > { %1316 = vmatpush.msrb.mxu2 %v1074_v4  ;;  %v1035_v25 = vld [vmem:[#allocation5 + $0x390] sm:$0xff]  ;;  %1261 = vmatpush.msra.mxu3 %v1117_v39  ;;  %v956_v39 = vld [vmem:[#allocation5 + $0x118] sm:$0xff] }
  0xfe   : > { %1278 = vmatpush.msrb.mxu0 %v938_v29  ;;  %1296 = vmatpush.msrb.mxu1 %v1010_v31  ;;  %v947_v27 = vld [vmem:[#allocation5 + $0xd0] sm:$0xff]  ;;  %v1174_v29 = vld [vmem:[#allocation5 + $0x7e8] sm:$0xff] }
  0xff   : > { %1203 = vmatmul.f32.vlgmr.msra.gmra.mxu0 %v2200_v36  ;;  %1317 = vmatpush.msrb.mxu2 %v1070_v9  ;;  %v943_v30 = vld [vmem:[#allocation5 + $0xb0] sm:$0xff]  ;;  %v968_v9 = vld [vmem:[#allocation5 + $0x178] sm:$0xff] }
 0x100   : > { %1279 = vmatpush.msrb.mxu0 %v934_v35  ;;  %1297 = vmatpush.msrb.mxu1 %v1006_v37  ;;  %v1027_v31 = vld [vmem:[#allocation5 + $0x350] sm:$0xff]  ;;  %v1166_v37 = vld [vmem:[#allocation5 + $0x7a8] sm:$0xff] }
 0x101   : > { %1318 = vmatpush.msrb.mxu2 %v1066_v13  ;;  %1262 = vmatpush.msra.mxu3 %v1113_v44  ;;  %v1023_v35 = vld [vmem:[#allocation5 + $0x330] sm:$0xff]  ;;  %v952_v44 = vld [vmem:[#allocation5 + $0xf8] sm:$0xff] }
 0x102   : > { %1280 = vmatpush.msrb.mxu0 %v930_v42  ;;  %1298 = vmatpush.msrb.mxu1 %v1002_v43  ;;  %v694_v53 = vpop.f32.mrf.mxu0  ;;  %v1162_v42 = vld [vmem:[#allocation5 + $0x788] sm:$0xff]  ;;  %v931_v43 = vld [vmem:[#allocation5 + $0x50] sm:$0xff] }
 0x103   : > { %v695_v56 = vadd.f32 %v694_v53, %v590_v45  ;;  %1319 = vmatpush.msrb.mxu2 %v1062_v33  ;;  %1327 = vmatpush.msrb.mxu3 %v1174_v29  ;;  %v1015_v45 = vld [vmem:[#allocation5 + $0x2f0] sm:$0xff]  ;;  %v1150_v53 = vld [vmem:[#allocation5 + $0x728] sm:$0xff]  ;;  %v1032_v29 = vld [vmem:[#allocation5 + $0x378] sm:$0xff] }
 0x104   : > { %1281 = vmatpush.msrb.mxu0 %v926_v48  ;;  %1299 = vmatpush.msrb.mxu1 %v998_v49  ;;  %v1011_v48 = vld [vmem:[#allocation5 + $0x2d0] sm:$0xff]  ;;  %v1154_v49 = vld [vmem:[#allocation5 + $0x748] sm:$0xff] }
 0x105   : > { %1320 = vmatpush.msrb.mxu2 %v1058_v38  ;;  %1328 = vmatpush.msrb.mxu3 %v1170_v32  ;;  %v999_v60 = vld [vmem:[#allocation5 + $0x270] sm:$0xff]  ;;  %v1122_v38 = vld [vmem:[#allocation5 + $0x648] sm:$0xff]  ;;  %v1028_v32 = vld [vmem:[#allocation5 + $0x358] sm:$0xff] }
 0x106   : > { %1282 = vmatpush.msrb.mxu0 %v922_v52  ;;  %1300 = vmatpush.msrb.mxu1 %v994_v54  ;;  %v714_v61 = vpop.f32.mrf.mxu1  ;;  %v734_v62 = vpop.f32.mrf.mxu2  ;;  %v1007_v52 = vld [vmem:[#allocation5 + $0x2b0] sm:$0xff]  ;;  %v984_v54 = vld [vmem:[#allocation5 + $0x1f8] sm:$0xff] }
 0x107   : > { %v715_v3 = vadd.f32 %v714_v61, %v695_v56  ;;  %1283 = vmatmul.f32.vlgmr.msrb.gmra.mxu0 %v2200_v36  ;;  %1321 = vmatpush.msrb.mxu2 %v1054_v23  ;;  %v1142_v61 = vld [vmem:[#allocation5 + $0x6e8] sm:$0xff] }
 0x108   : > { %1347 = vmatpush.msra.mxu0 %v983_v55  ;;  %1301 = vmatpush.msrb.mxu1 %v990_v58  ;;  %v1003_v55 = vld [vmem:[#allocation5 + $0x290] sm:$0xff]  ;;  %v980_v58 = vld [vmem:[#allocation5 + $0x1d8] sm:$0xff]  ;;  %v1118_v23 = vld [vmem:[#allocation5 + $0x628] sm:$0xff] }
 0x109   : > { %v735_v7 = vadd.f32 %v734_v62, %v715_v3  ;;  %v754_v8 = vpop.f32.mrf.mxu3  ;;  %1322 = vmatpush.msrb.mxu2 %v1050_v26  ;;  %1329 = vmatpush.msrb.mxu3 %v1166_v37  ;;  %v976_v62 = vld [vmem:[#allocation5 + $0x1b8] sm:$0xff]  ;;  %v1138_v3 = vld [vmem:[#allocation5 + $0x6c8] sm:$0xff] }
 0x10a   : > { %1348 = vmatpush.msra.mxu0 %v979_v59  ;;  %1302 = vmatpush.msrb.mxu1 %v986_v63  ;;  %v995_v63 = vld [vmem:[#allocation5 + $0x250] sm:$0xff]  ;;  %v1114_v26 = vld [vmem:[#allocation5 + $0x608] sm:$0xff]  ;;  %v1024_v37 = vld [vmem:[#allocation5 + $0x338] sm:$0xff] }
 0x10b   : > { %v755_v12 = vadd.f32 %v754_v8, %v735_v7  ;;  %1330 = vmatpush.msrb.mxu3 %v1162_v42  ;;  %v1134_v7 = vld [vmem:[#allocation5 + $0x6a8] sm:$0xff]  ;;  %v1020_v42 = vld [vmem:[#allocation5 + $0x318] sm:$0xff] }
 0x10c   : > { %1349 = vmatpush.msra.mxu0 %v975_v2 }
 0x10d   : > { %v2205_v15 = vmax.f32 %v755_v12, 0.0  ;;  %1331 = vmatpush.msrb.mxu3 %v1158_v46  ;;  %v1130_v12 = vld [vmem:[#allocation5 + $0x688] sm:$0xff]  ;;  %v1016_v46 = vld [vmem:[#allocation5 + $0x2f8] sm:$0xff] }
 0x10e   : > { %1350 = vmatpush.msra.mxu0 %v971_v6  ;;  %v991_v6 = vld [vmem:[#allocation5 + $0x230] sm:$0xff] }
 0x10f   : > { %1223 = vmatmul.f32.vlgmr.msra.gmra.mxu1 %v2205_v15  ;;  %1332 = vmatpush.msrb.mxu3 %v1154_v49  ;;  %v1012_v49 = vld [vmem:[#allocation5 + $0x2d8] sm:$0xff] }
 0x110   : > { %1351 = vmatpush.msra.mxu0 %v967_v11  ;;  %1367 = vmatpush.msra.mxu1 %v1047_v17  ;;  %v987_v11 = vld [vmem:[#allocation5 + $0x210] sm:$0xff]  ;;  %v1126_v17 = vld [vmem:[#allocation5 + $0x668] sm:$0xff] }
 0x111   : > { %1333 = vmatpush.msrb.mxu3 %v1150_v53  ;;  %v592_v53 = vperm.slane %v2197_v0, 3  ;;  %v1059_v0 = vld [vmem:[#allocation5 + $0x450] sm:$0xff] }
 0x112   : > { %1352 = vmatpush.msra.mxu0 %v963_v16  ;;  %1368 = vmatpush.msra.mxu1 %v1043_v20  ;;  %v1048_v16 = vld [vmem:[#allocation5 + $0x3f8] sm:$0xff] }
 0x113   : > { %1334 = vmatpush.msrb.mxu3 %v1146_v57  ;;  %v1044_v20 = vld [vmem:[#allocation5 + $0x3d8] sm:$0xff] }
 0x114   : > { %1353 = vmatpush.msra.mxu0 %v959_v19  ;;  %1369 = vmatpush.msra.mxu1 %v1039_v22  ;;  %v1111_v19 = vld [vmem:[#allocation5 + $0x5f0] sm:$0xff]  ;;  %v1040_v22 = vld [vmem:[#allocation5 + $0x3b8] sm:$0xff] }
 0x115   : > { %1335 = vmatpush.msrb.mxu3 %v1142_v61 }
 0x116   : > { %1354 = vmatpush.msra.mxu0 %v955_v21  ;;  %1370 = vmatpush.msra.mxu1 %v1035_v25  ;;  %v1107_v21 = vld [vmem:[#allocation5 + $0x5d0] sm:$0xff]  ;;  %v1036_v25 = vld [vmem:[#allocation5 + $0x398] sm:$0xff] }
 0x117   : > { %1303 = vmatmul.f32.vlgmr.msrb.gmra.mxu1 %v2205_v15  ;;  %1336 = vmatpush.msrb.mxu3 %v1138_v3 }
 0x118   : > { %1355 = vmatpush.msra.mxu0 %v951_v24  ;;  %1371 = vmatpush.msra.mxu1 %v1031_v28  ;;  %v1103_v24 = vld [vmem:[#allocation5 + $0x5b0] sm:$0xff] }
 0x119   : > { %1337 = vmatpush.msrb.mxu3 %v1134_v7  ;;  %v1099_v28 = vld [vmem:[#allocation5 + $0x590] sm:$0xff] }
 0x11a   : > { %1356 = vmatpush.msra.mxu0 %v947_v27  ;;  %1372 = vmatpush.msra.mxu1 %v1027_v31  ;;  %v948_v27 = vld [vmem:[#allocation5 + $0xd8] sm:$0xff]  ;;  %v1095_v31 = vld [vmem:[#allocation5 + $0x570] sm:$0xff] }
 0x11b   : > { %1338 = vmatpush.msrb.mxu3 %v1130_v12  ;;  %v1051_v7 = vld [vmem:[#allocation5 + $0x410] sm:$0xff]  ;;  %v1108_v12 = vld [vmem:[#allocation5 + $0x5d8] sm:$0xff] }
 0x11c   : > { %1357 = vmatpush.msra.mxu0 %v943_v30  ;;  %1373 = vmatpush.msra.mxu1 %v1023_v35  ;;  %v944_v30 = vld [vmem:[#allocation5 + $0xb8] sm:$0xff]  ;;  %v1091_v35 = vld [vmem:[#allocation5 + $0x550] sm:$0xff] }
 0x11d   : > { %1339 = vmatpush.msrb.mxu3 %v1126_v17  ;;  %v1100_v17 = vld [vmem:[#allocation5 + $0x598] sm:$0xff] }
 0x11e   : > { %1358 = vmatpush.msra.mxu0 %v939_v34  ;;  %1374 = vmatpush.msra.mxu1 %v1019_v41  ;;  %v940_v34 = vld [vmem:[#allocation5 + $0x98] sm:$0xff]  ;;  %v1087_v41 = vld [vmem:[#allocation5 + $0x530] sm:$0xff] }
 0x11f   : > { %1340 = vmatpush.msrb.mxu3 %v1122_v38  ;;  %v1151_v38 = vld [vmem:[#allocation5 + $0x730] sm:$0xff] }
 0x120   : > { %1359 = vmatpush.msra.mxu0 %v935_v40  ;;  %1375 = vmatpush.msra.mxu1 %v1015_v45  ;;  %v936_v40 = vld [vmem:[#allocation5 + $0x78] sm:$0xff]  ;;  %v1083_v45 = vld [vmem:[#allocation5 + $0x510] sm:$0xff] }
 0x121   : > { %1341 = vmatpush.msrb.mxu3 %v1118_v23  ;;  %v1143_v23 = vld [vmem:[#allocation5 + $0x6f0] sm:$0xff] }
 0x122   : > { %1360 = vmatpush.msra.mxu0 %v931_v43  ;;  %1376 = vmatpush.msra.mxu1 %v1011_v48  ;;  %v932_v43 = vld [vmem:[#allocation5 + $0x58] sm:$0xff]  ;;  %v1079_v48 = vld [vmem:[#allocation5 + $0x4f0] sm:$0xff] }
 0x123   : > { %1342 = vmatpush.msrb.mxu3 %v1114_v26  ;;  %v1135_v26 = vld [vmem:[#allocation5 + $0x6b0] sm:$0xff] }
 0x124   : > { %1361 = vmatpush.msra.mxu0 %v927_v47  ;;  %v774_v56 = vpop.f32.mrf.mxu0  ;;  %1377 = vmatpush.msra.mxu1 %v1007_v52  ;;  %v928_v47 = vld [vmem:[#allocation5 + $0x38] sm:$0xff] }
 0x125   : > { %v775_v59 = vadd.f32 %v774_v56, %v591_v51  ;;  %v1075_v51 = vld [vmem:[#allocation5 + $0x4d0] sm:$0xff]  ;;  %v1008_v52 = vld [vmem:[#allocation5 + $0x2b8] sm:$0xff] }
 0x126   : > { %1362 = vmatpush.msra.mxu0 %v923_v50  ;;  %1378 = vmatpush.msra.mxu1 %v1003_v55  ;;  %v924_v50 = vld [vmem:[#allocation5 + $0x18] sm:$0xff]  ;;  %v1067_v56 = vld [vmem:[#allocation5 + $0x490] sm:$0xff] }
 0x127   : > { %1363 = vmatmul.f32.vlgmr.msra.gmra.mxu0 %v2200_v36  ;;  %v1004_v55 = vld [vmem:[#allocation5 + $0x298] sm:$0xff] }
 0x128   : > { %1427 = vmatpush.msrb.mxu0 %v984_v54  ;;  %v794_v1 = vpop.f32.mrf.mxu1  ;;  %v814_v2 = vpop.f32.mrf.mxu2  ;;  %1379 = vmatpush.msra.mxu1 %v999_v60  ;;  %v1071_v54 = vld [vmem:[#allocation5 + $0x4b0] sm:$0xff] }
 0x129   : > { %v795_v4 = vadd.f32 %v794_v1, %v775_v59  ;;  %v1063_v60 = vld [vmem:[#allocation5 + $0x470] sm:$0xff] }
 0x12a   : > { %1428 = vmatpush.msrb.mxu0 %v980_v58  ;;  %1380 = vmatpush.msra.mxu1 %v995_v63  ;;  %v1000_v58 = vld [vmem:[#allocation5 + $0x278] sm:$0xff] }
 0x12b   : > { %v815_v8 = vadd.f32 %v814_v2, %v795_v4  ;;  %v834_v10 = vpop.f32.mrf.mxu3  ;;  %v992_v2 = vld [vmem:[#allocation5 + $0x238] sm:$0xff] }
 0x12c   : > { %1429 = vmatpush.msrb.mxu0 %v976_v62  ;;  %1381 = vmatpush.msra.mxu1 %v991_v6  ;;  %v996_v62 = vld [vmem:[#allocation5 + $0x258] sm:$0xff] }
 0x12d   : > { %v835_v13 = vadd.f32 %v834_v10, %v815_v8  ;;  %v1112_v10 = vld [vmem:[#allocation5 + $0x5f8] sm:$0xff] }
 0x12e   : > { %1430 = vmatpush.msrb.mxu0 %v972_v5  ;;  %1382 = vmatpush.msra.mxu1 %v987_v11  ;;  %v988_v5 = vld [vmem:[#allocation5 + $0x218] sm:$0xff]  ;;  %v1171_v11 = vld [vmem:[#allocation5 + $0x7d0] sm:$0xff] }
 0x12f   : > { %v2211_v33 = vmax.f32 %v835_v13, 0.0  ;;  %1383 = vmatmul.f32.vlgmr.msra.gmra.mxu1 %v2205_v15  ;;  %v1167_v13 = vld [vmem:[#allocation5 + $0x7b0] sm:$0xff] }
 0x130   : > { %1431 = vmatpush.msrb.mxu0 %v968_v9  ;;  %1447 = vmatpush.msrb.mxu1 %v1048_v16  ;;  %v1175_v9 = vld [vmem:[#allocation5 + $0x7f0] sm:$0xff] }
 0x131   : > { %1243 = vmatmul.f32.vlgmr.msra.gmra.mxu2 %v2211_v33  ;;  %v1163_v16 = vld [vmem:[#allocation5 + $0x790] sm:$0xff] }
 0x132   : > { %1432 = vmatpush.msrb.mxu0 %v964_v14  ;;  %1387 = vmatpush.msra.mxu2 %v1111_v19  ;;  %v1104_v14 = vld [vmem:[#allocation5 + $0x5b8] sm:$0xff] }
 0x133   : > { %1448 = vmatpush.msrb.mxu1 %v1044_v20  ;;  %v1096_v19 = vld [vmem:[#allocation5 + $0x578] sm:$0xff] }
 0x134   : > { %1433 = vmatpush.msrb.mxu0 %v960_v18  ;;  %1388 = vmatpush.msra.mxu2 %v1107_v21  ;;  %v1159_v18 = vld [vmem:[#allocation5 + $0x770] sm:$0xff]  ;;  %v1092_v20 = vld [vmem:[#allocation5 + $0x558] sm:$0xff] }
 0x135   : > { %1449 = vmatpush.msrb.mxu1 %v1040_v22  ;;  %v1147_v21 = vld [vmem:[#allocation5 + $0x710] sm:$0xff]  ;;  %v1084_v22 = vld [vmem:[#allocation5 + $0x518] sm:$0xff] }
 0x136   : > { %1434 = vmatpush.msrb.mxu0 %v956_v39  ;;  %1389 = vmatpush.msra.mxu2 %v1103_v24  ;;  %v1088_v39 = vld [vmem:[#allocation5 + $0x538] sm:$0xff]  ;;  %v1139_v24 = vld [vmem:[#allocation5 + $0x6d0] sm:$0xff] }
 0x137   : > { %1450 = vmatpush.msrb.mxu1 %v1036_v25  ;;  %v1076_v25 = vld [vmem:[#allocation5 + $0x4d8] sm:$0xff] }
 0x138   : > { %1435 = vmatpush.msrb.mxu0 %v952_v44  ;;  %1390 = vmatpush.msra.mxu2 %v1099_v28  ;;  %v1080_v44 = vld [vmem:[#allocation5 + $0x4f8] sm:$0xff]  ;;  %v1131_v28 = vld [vmem:[#allocation5 + $0x690] sm:$0xff] }
 0x139   : > { %1323 = vmatmul.f32.vlgmr.msrb.gmra.mxu2 %v2211_v33  ;;  %1451 = vmatpush.msrb.mxu1 %v1032_v29  ;;  %v1068_v29 = vld [vmem:[#allocation5 + $0x498] sm:$0xff] }
 0x13a   : > { %1436 = vmatpush.msrb.mxu0 %v948_v27  ;;  %1391 = vmatpush.msra.mxu2 %v1095_v31  ;;  %v1072_v27 = vld [vmem:[#allocation5 + $0x4b8] sm:$0xff] }
 0x13b   : > { %1452 = vmatpush.msrb.mxu1 %v1028_v32  ;;  %v1064_v31 = vld [vmem:[#allocation5 + $0x478] sm:$0xff]  ;;  %v1123_v32 = vld [vmem:[#allocation5 + $0x650] sm:$0xff] }
 0x13c   : > { %1437 = vmatpush.msrb.mxu0 %v944_v30  ;;  %1392 = vmatpush.msra.mxu2 %v1091_v35  ;;  %v1127_v30 = vld [vmem:[#allocation5 + $0x670] sm:$0xff] }
 0x13d   : > { %1453 = vmatpush.msrb.mxu1 %v1024_v37  ;;  %v1119_v35 = vld [vmem:[#allocation5 + $0x630] sm:$0xff]  ;;  %v1056_v37 = vld [vmem:[#allocation5 + $0x438] sm:$0xff] }
 0x13e   : > { %1438 = vmatpush.msrb.mxu0 %v940_v34  ;;  %1393 = vmatpush.msra.mxu2 %v1087_v41  ;;  %v1060_v34 = vld [vmem:[#allocation5 + $0x458] sm:$0xff] }
 0x13f   : > { %1454 = vmatpush.msrb.mxu1 %v1020_v42  ;;  %v1052_v41 = vld [vmem:[#allocation5 + $0x418] sm:$0xff] }
 0x140   : > { %1439 = vmatpush.msrb.mxu0 %v936_v40  ;;  %1394 = vmatpush.msra.mxu2 %v1083_v45  ;;  %v1115_v40 = vld [vmem:[#allocation5 + $0x610] sm:$0xff]  ;;  %v1176_v42 = vld [vmem:[#allocation5 + $0x7f8] sm:$0xff] }
 0x141   : > { %1455 = vmatpush.msrb.mxu1 %v1016_v46  ;;  %v1168_v45 = vld [vmem:[#allocation5 + $0x7b8] sm:$0xff] }
 0x142   : > { %1440 = vmatpush.msrb.mxu0 %v932_v43  ;;  %1395 = vmatpush.msra.mxu2 %v1079_v48  ;;  %v1172_v43 = vld [vmem:[#allocation5 + $0x7d8] sm:$0xff] }
 0x143   : > { %1456 = vmatpush.msrb.mxu1 %v1012_v49  ;;  %v1164_v46 = vld [vmem:[#allocation5 + $0x798] sm:$0xff] }
 0x144   : > { %1441 = vmatpush.msrb.mxu0 %v928_v47  ;;  %1396 = vmatpush.msra.mxu2 %v1075_v51  ;;  %v1160_v47 = vld [vmem:[#allocation5 + $0x778] sm:$0xff] }
 0x145   : > { %1457 = vmatpush.msrb.mxu1 %v1008_v52  ;;  %v1156_v48 = vld [vmem:[#allocation5 + $0x758] sm:$0xff] }
 0x146   : > { %1442 = vmatpush.msrb.mxu0 %v924_v50  ;;  %v854_v57 = vpop.f32.mrf.mxu0  ;;  %1397 = vmatpush.msra.mxu2 %v1071_v54  ;;  %v1152_v49 = vld [vmem:[#allocation5 + $0x738] sm:$0xff] }
 0x147   : > { %1443 = vmatmul.f32.vlgmr.msrb.gmra.mxu0 %v2200_v36  ;;  %v855_v59 = vadd.f32 %v854_v57, %v592_v53  ;;  %1458 = vmatpush.msrb.mxu1 %v1004_v55  ;;  %v1055_v36 = vld [vmem:[#allocation5 + $0x430] sm:$0xff]  ;;  %v1148_v50 = vld [vmem:[#allocation5 + $0x718] sm:$0xff] }
 0x148   : > { %v874_v61 = vpop.f32.mrf.mxu1  ;;  %1398 = vmatpush.msra.mxu2 %v1067_v56  ;;  %v1144_v51 = vld [vmem:[#allocation5 + $0x6f8] sm:$0xff] }
 0x149   : > { %v875_v63 = vadd.f32 %v874_v61, %v855_v59  ;;  %1459 = vmatpush.msrb.mxu1 %v1000_v58  ;;  %v1140_v52 = vld [vmem:[#allocation5 + $0x6d8] sm:$0xff]  ;;  %v1525_v59 = vld [vmem:[#allocation7 + $0x70] sm:$0xff]  ;;  %v1523_v61 = vld [vmem:[#allocation7 + $0x60] sm:$0xff] }
 0x14a   : > { %v894_v1 = vpop.f32.mrf.mxu2  ;;  %1399 = vmatpush.msra.mxu2 %v1063_v60  ;;  %v1136_v53 = vld [vmem:[#allocation5 + $0x6b8] sm:$0xff]  ;;  %v1524_v60 = vld [vmem:[#allocation7 + $0x68] sm:$0xff] }
 0x14b   : > { %v895_v3 = vadd.f32 %v894_v1, %v875_v63  ;;  %1460 = vmatpush.msrb.mxu1 %v996_v62  ;;  %v1128_v54 = vld [vmem:[#allocation5 + $0x678] sm:$0xff]  ;;  %v1541_v1 = vld [vmem:[#allocation7 + $0xf0] sm:$0xff] }
 0x14c   : > { %v914_v4 = vpop.f32.mrf.mxu3  ;;  %1400 = vmatpush.msra.mxu2 %v1059_v0  ;;  %v1124_v55 = vld [vmem:[#allocation5 + $0x658] sm:$0xff]  ;;  %v1521_v0 = vld [vmem:[#allocation7 + $0x50] sm:$0xff] }
 0x14d   : > { %v915_v6 = vadd.f32 %v914_v4, %v895_v3  ;;  %1461 = vmatpush.msrb.mxu1 %v992_v2  ;;  %v1120_v56 = vld [vmem:[#allocation5 + $0x638] sm:$0xff]  ;;  %v1520_v2 = vld [vmem:[#allocation7 + $0x48] sm:$0xff]  ;;  %v1539_v4 = vld [vmem:[#allocation7 + $0xe0] sm:$0xff] }
 0x14e   : > { %1401 = vmatpush.msra.mxu2 %v1055_v36  ;;  %v1116_v57 = vld [vmem:[#allocation5 + $0x618] sm:$0xff]  ;;  %v1540_v3 = vld [vmem:[#allocation7 + $0xe8] sm:$0xff]  ;;  %v1519_v36 = vld [vmem:[#allocation7 + $0x40] sm:$0xff] }
 0x14f   : > { %v2218_v8 = vmax.f32 %v915_v6, 0.0  ;;  %1462 = vmatpush.msrb.mxu1 %v988_v5  ;;  %v1526_v58 = vld [vmem:[#allocation7 + $0x78] sm:$0xff] }
 0x150   : > { %1402 = vmatpush.msra.mxu2 %v1051_v7  ;;  %1463 = vmatmul.f32.vlgmr.msrb.gmra.mxu1 %v2205_v15  ;;  %v1155_v15 = vld [vmem:[#allocation5 + $0x750] sm:$0xff]  ;;  %v1522_v62 = vld [vmem:[#allocation7 + $0x58] sm:$0xff] }
 0x151   : > { %1263 = vmatmul.f32.vlgmr.msra.gmra.mxu3 %v2218_v8  ;;  %1403 = vmatmul.f32.vlgmr.msra.gmra.mxu2 %v2211_v33  ;;  %v1542_v63 = vld [vmem:[#allocation7 + $0xf8] sm:$0xff]  ;;  %v1517_v7 = vld [vmem:[#allocation7 + $0x30] sm:$0xff] }
 0x152   : > { %1407 = vmatpush.msra.mxu3 %v1175_v9  ;;  %1467 = vmatpush.msrb.mxu2 %v1112_v10  ;;  %v1518_v5 = vld [vmem:[#allocation7 + $0x38] sm:$0xff]  ;;  %v1516_v9 = vld [vmem:[#allocation7 + $0x28] sm:$0xff] }
 0x153   : > { %1579 = vmatpush.msra.mxu0 %v1526_v58  ;;  %1599 = vmatpush.msra.mxu1 %v1542_v63  ;;  %v1538_v6 = vld [vmem:[#allocation7 + $0xd8] sm:$0xff]  ;;  %v1536_v10 = vld [vmem:[#allocation7 + $0xc8] sm:$0xff] }
 0x154   : > { %1408 = vmatpush.msra.mxu3 %v1171_v11  ;;  %1468 = vmatpush.msrb.mxu2 %v1108_v12  ;;  %v1515_v11 = vld [vmem:[#allocation7 + $0x20] sm:$0xff] }
 0x155   : > { %1580 = vmatpush.msra.mxu0 %v1525_v59  ;;  %1600 = vmatpush.msra.mxu1 %v1541_v1  ;;  %v1535_v12 = vld [vmem:[#allocation7 + $0xc0] sm:$0xff]  ;;  %v1574_v59 = vld [vmem:[#allocation7 + $0x1f8] sm:$0xff] }
 0x156   : > { %1409 = vmatpush.msra.mxu3 %v1167_v13  ;;  %1469 = vmatpush.msrb.mxu2 %v1104_v14  ;;  %v1514_v13 = vld [vmem:[#allocation7 + $0x18] sm:$0xff]  ;;  %v1571_v1 = vld [vmem:[#allocation7 + $0x1e0] sm:$0xff] }
 0x157   : > { %1581 = vmatpush.msra.mxu0 %v1524_v60  ;;  %1601 = vmatpush.msra.mxu1 %v1540_v3  ;;  %v1534_v14 = vld [vmem:[#allocation7 + $0xb8] sm:$0xff]  ;;  %v1573_v60 = vld [vmem:[#allocation7 + $0x1f0] sm:$0xff] }
 0x158   : > { %1410 = vmatpush.msra.mxu3 %v1163_v16  ;;  %1470 = vmatpush.msrb.mxu2 %v1100_v17  ;;  %v1513_v16 = vld [vmem:[#allocation7 + $0x10] sm:$0xff]  ;;  %v1570_v3 = vld [vmem:[#allocation7 + $0x1d8] sm:$0xff] }
 0x159   : > { %1343 = vmatmul.f32.vlgmr.msrb.gmra.mxu3 %v2218_v8  ;;  %1582 = vmatpush.msra.mxu0 %v1523_v61  ;;  %v1533_v17 = vld [vmem:[#allocation7 + $0xb0] sm:$0xff] }
 0x15a   : > { %1411 = vmatpush.msra.mxu3 %v1159_v18  ;;  %1471 = vmatpush.msrb.mxu2 %v1096_v19  ;;  %v1512_v18 = vld [vmem:[#allocation7 + $0x8] sm:$0xff] }
 0x15b   : > { %1583 = vmatpush.msra.mxu0 %v1522_v62  ;;  %1602 = vmatpush.msra.mxu1 %v1539_v4  ;;  %v1532_v19 = vld [vmem:[#allocation7 + $0xa8] sm:$0xff] }
 0x15c   : > { %1412 = vmatpush.msra.mxu3 %v1155_v15  ;;  %1472 = vmatpush.msrb.mxu2 %v1092_v20  ;;  %v1511_v15 = vld [vmem:[#allocation7] sm:$0xff]  ;;  %v1572_v62 = vld [vmem:[#allocation7 + $0x1e8] sm:$0xff] }
 0x15d   : > { %1584 = vmatpush.msra.mxu0 %v1521_v0  ;;  %1603 = vmatpush.msra.mxu1 %v1538_v6  ;;  %v1531_v20 = vld [vmem:[#allocation7 + $0xa0] sm:$0xff]  ;;  %v1568_v4 = vld [vmem:[#allocation7 + $0x1c8] sm:$0xff]  ;;  %v1566_v6 = vld [vmem:[#allocation7 + $0x1b8] sm:$0xff] }
 0x15e   : > { %1413 = vmatpush.msra.mxu3 %v1151_v38  ;;  %1473 = vmatpush.msrb.mxu2 %v1088_v39  ;;  %v1558_v38 = vld [vmem:[#allocation7 + $0x178] sm:$0xff] }
 0x15f   : > { %1585 = vmatpush.msra.mxu0 %v1520_v2  ;;  %v1530_v39 = vld [vmem:[#allocation7 + $0x98] sm:$0xff] }
 0x160   : > { %1414 = vmatpush.msra.mxu3 %v1147_v21  ;;  %1474 = vmatpush.msrb.mxu2 %v1084_v22  ;;  %v1557_v21 = vld [vmem:[#allocation7 + $0x170] sm:$0xff] }
 0x161   : > { %1586 = vmatpush.msra.mxu0 %v1519_v36  ;;  %v1529_v22 = vld [vmem:[#allocation7 + $0x90] sm:$0xff] }
 0x162   : > { %1415 = vmatpush.msra.mxu3 %v1143_v23  ;;  %1475 = vmatpush.msrb.mxu2 %v1080_v44  ;;  %v1556_v23 = vld [vmem:[#allocation7 + $0x168] sm:$0xff]  ;;  %v1569_v36 = vld [vmem:[#allocation7 + $0x1d0] sm:$0xff] }
 0x163   : > { %1587 = vmatpush.msra.mxu0 %v1518_v5  ;;  %v1528_v44 = vld [vmem:[#allocation7 + $0x88] sm:$0xff]  ;;  %v1567_v5 = vld [vmem:[#allocation7 + $0x1c0] sm:$0xff] }
 0x164   : > { %1416 = vmatpush.msra.mxu3 %v1139_v24  ;;  %1476 = vmatpush.msrb.mxu2 %v1076_v25  ;;  %v1555_v24 = vld [vmem:[#allocation7 + $0x160] sm:$0xff] }
 0x165   : > { %1588 = vmatpush.msra.mxu0 %v1517_v7  ;;  %v1527_v25 = vld [vmem:[#allocation7 + $0x80] sm:$0xff]  ;;  %v1565_v7 = vld [vmem:[#allocation7 + $0x1b0] sm:$0xff] }
 0x166   : > { %1417 = vmatpush.msra.mxu3 %v1135_v26  ;;  %1477 = vmatpush.msrb.mxu2 %v1072_v27  ;;  %v1554_v26 = vld [vmem:[#allocation7 + $0x158] sm:$0xff]  ;;  %v1553_v27 = vld [vmem:[#allocation7 + $0x150] sm:$0xff] }
 0x167   : > { %1589 = vmatpush.msra.mxu0 %v1516_v9  ;;  %v1564_v9 = vld [vmem:[#allocation7 + $0x1a8] sm:$0xff] }
 0x168   : > { %1418 = vmatpush.msra.mxu3 %v1131_v28  ;;  %1478 = vmatpush.msrb.mxu2 %v1068_v29  ;;  %v1552_v28 = vld [vmem:[#allocation7 + $0x148] sm:$0xff]  ;;  %v2230_v29 = vld [vmem:[%s2275_s4] sm:$0xf] }
 0x169   : > { %1590 = vmatpush.msra.mxu0 %v1515_v11  ;;  %v1563_v11 = vld [vmem:[#allocation7 + $0x1a0] sm:$0xff] }
 0x16a   : > { %1419 = vmatpush.msra.mxu3 %v1127_v30  ;;  %1479 = vmatpush.msrb.mxu2 %v1064_v31  ;;  %v1551_v30 = vld [vmem:[#allocation7 + $0x140] sm:$0xff]  ;;  %v1550_v31 = vld [vmem:[#allocation7 + $0x138] sm:$0xff] }
 0x16b   : > { %1591 = vmatpush.msra.mxu0 %v1514_v13 }
 0x16c   : > { %1420 = vmatpush.msra.mxu3 %v1123_v32  ;;  %1480 = vmatpush.msrb.mxu2 %v1060_v34  ;;  %v1179_v32 = vperm.slane %v2230_v29, 0 }
 0x16d   : > { %1592 = vmatpush.msra.mxu0 %v1513_v16 }
 0x16e   : > { %1421 = vmatpush.msra.mxu3 %v1119_v35  ;;  %1481 = vmatpush.msrb.mxu2 %v1056_v37  ;;  %v1549_v35 = vld [vmem:[#allocation7 + $0x130] sm:$0xff] }
 0x16f   : > { %1593 = vmatpush.msra.mxu0 %v1512_v18 }
 0x170   : > { %1422 = vmatpush.msra.mxu3 %v1115_v40  ;;  %1482 = vmatpush.msrb.mxu2 %v1052_v41  ;;  %v1548_v40 = vld [vmem:[#allocation7 + $0x128] sm:$0xff] }
 0x171   : > { %1423 = vmatmul.f32.vlgmr.msra.gmra.mxu3 %v2218_v8  ;;  %1483 = vmatmul.f32.vlgmr.msrb.gmra.mxu2 %v2211_v33  ;;  %v1132_v33 = vld [vmem:[#allocation5 + $0x698] sm:$0xff] }
 0x172   : > { %1487 = vmatpush.msrb.mxu3 %v1176_v42  ;;  %1594 = vmatpush.msra.mxu0 %v1511_v15 }
 0x173   : > { %1619 = vmatpush.msra.mxu2 %v1558_v38  ;;  %v1560_v38 = vld [vmem:[#allocation7 + $0x188] sm:$0xff] }
 0x174   : > { %1488 = vmatpush.msrb.mxu3 %v1172_v43  ;;  %v1547_v43 = vld [vmem:[#allocation7 + $0x120] sm:$0xff] }
 0x175   : > { %1620 = vmatpush.msra.mxu2 %v1557_v21  ;;  %v1559_v21 = vld [vmem:[#allocation7 + $0x180] sm:$0xff] }
 0x176   : > { %1489 = vmatpush.msrb.mxu3 %v1168_v45  ;;  %v1546_v45 = vld [vmem:[#allocation7 + $0x118] sm:$0xff] }
 0x177   : > { %1621 = vmatpush.msra.mxu2 %v1556_v23 }
 0x178   : > { %1490 = vmatpush.msrb.mxu3 %v1164_v46 }
 0x179   : > { %1622 = vmatpush.msra.mxu2 %v1555_v24 }
 0x17a   : > { %1491 = vmatpush.msrb.mxu3 %v1160_v47  ;;  %v1180_v47 = vperm.slane %v2230_v29, 1 }
 0x17b   : > { %1623 = vmatpush.msra.mxu2 %v1554_v26 }
 0x17c   : > { %1492 = vmatpush.msrb.mxu3 %v1156_v48  ;;  %v1204_v34 = vpop.f32.mrf.mxu0 }
 0x17d   : > { %1624 = vmatpush.msra.mxu2 %v1553_v27  ;;  %v1205_v41 = vadd.f32 %v1204_v34, %v1179_v32  ;;  %v1858_v32 = vld [vmem:[%s2277_s6] ss:$0 sm:$0xff] }
 0x17e   : > { %1493 = vmatpush.msrb.mxu3 %v1152_v49 }
 0x17f   : > { %1625 = vmatpush.msra.mxu2 %v1552_v28 }
 0x180   : > { %1494 = vmatpush.msrb.mxu3 %v1148_v50 }
 0x181   : > { %1626 = vmatpush.msra.mxu2 %v1551_v30 }
 0x182   : > { %1495 = vmatpush.msrb.mxu3 %v1144_v51  ;;  %v1545_v51 = vld [vmem:[#allocation7 + $0x110] sm:$0xff] }
 0x183   : > { %1627 = vmatpush.msra.mxu2 %v1550_v31 }
 0x184   : > { %1496 = vmatpush.msrb.mxu3 %v1140_v52  ;;  %v1284_v49 = vpop.f32.mrf.mxu0 }
 0x185   : > { %1628 = vmatpush.msra.mxu2 %v1549_v35 }
 0x186   : > { %1497 = vmatpush.msrb.mxu3 %v1136_v53 }
 0x187   : > { %1629 = vmatpush.msra.mxu2 %v1548_v40 }
 0x188   : > { %1498 = vmatpush.msrb.mxu3 %v1132_v33  ;;  %v1544_v33 = vld [vmem:[#allocation7 + $0x108] sm:$0xff] }
 0x189   : > { %1630 = vmatpush.msra.mxu2 %v1547_v43 }
 0x18a   : > { %1499 = vmatpush.msrb.mxu3 %v1128_v54  ;;  %v1285_v54 = vadd.f32 %v1284_v49, %v1180_v47 }
 0x18b   : > { %1631 = vmatpush.msra.mxu2 %v1546_v45 }
 0x18c   : > { %1500 = vmatpush.msrb.mxu3 %v1124_v55  ;;  %v1224_v37 = vpop.f32.mrf.mxu1 }
 0x18d   : > { %v1225_v46 = vadd.f32 %v1224_v37, %v1205_v41  ;;  %1632 = vmatpush.msra.mxu2 %v1545_v51 }
 0x18e   : > { %1501 = vmatpush.msrb.mxu3 %v1120_v56  ;;  %v1543_v56 = vld [vmem:[#allocation7 + $0x100] sm:$0xff] }
 0x18f   : > { %1633 = vmatpush.msra.mxu2 %v1544_v33 }
 0x190   : > { %1502 = vmatpush.msrb.mxu3 %v1116_v57 }
 0x191   : > { %1503 = vmatmul.f32.vlgmr.msrb.gmra.mxu3 %v2218_v8  ;;  %v1537_v8 = vld [vmem:[#allocation7 + $0xd0] sm:$0xff]  ;;  %1634 = vmatpush.msra.mxu2 %v1543_v56 }
 0x192   : > { %1604 = vmatpush.msra.mxu1 %v1537_v8  ;;  %1639 = vmatpush.msra.mxu3 %v1574_v59  ;;  %v1181_v8 = vperm.slane %v2230_v29, 2 }
 0x194   : > { %1605 = vmatpush.msra.mxu1 %v1536_v10  ;;  %v1304_v53 = vpop.f32.mrf.mxu1  ;;  %1640 = vmatpush.msra.mxu3 %v1573_v60 }
 0x195   : > { %v1305_v58 = vadd.f32 %v1304_v53, %v1285_v54 }
 0x196   : > { %1606 = vmatpush.msra.mxu1 %v1535_v12  ;;  %1641 = vmatpush.msra.mxu3 %v1572_v62 }
 0x198   : > { %1607 = vmatpush.msra.mxu1 %v1534_v14  ;;  %1642 = vmatpush.msra.mxu3 %v1571_v1  ;;  %v1562_v14 = vld [vmem:[#allocation7 + $0x198] sm:$0xff] }
 0x19a   : > { %1608 = vmatpush.msra.mxu1 %v1533_v17  ;;  %1643 = vmatpush.msra.mxu3 %v1570_v3 }
 0x19c   : > { %1609 = vmatpush.msra.mxu1 %v1532_v19  ;;  %1644 = vmatpush.msra.mxu3 %v1569_v36  ;;  %v1561_v19 = vld [vmem:[#allocation7 + $0x190] sm:$0xff] }
 0x19e   : > { %1610 = vmatpush.msra.mxu1 %v1531_v20  ;;  %1645 = vmatpush.msra.mxu3 %v1568_v4 }
 0x1a0   : > { %1611 = vmatpush.msra.mxu1 %v1530_v39  ;;  %1646 = vmatpush.msra.mxu3 %v1567_v5 }
 0x1a2   : > { %1612 = vmatpush.msra.mxu1 %v1529_v22  ;;  %1647 = vmatpush.msra.mxu3 %v1566_v6  ;;  %v1182_v22 = vperm.slane %v2230_v29, 3 }
 0x1a4   : > { %1613 = vmatpush.msra.mxu1 %v1528_v44  ;;  %v1364_v10 = vpop.f32.mrf.mxu0  ;;  %1648 = vmatpush.msra.mxu3 %v1565_v7 }
 0x1a5   : > { %v1365_v13 = vadd.f32 %v1364_v10, %v1181_v8 }
 0x1a6   : > { %1614 = vmatpush.msra.mxu1 %v1527_v25  ;;  %1649 = vmatpush.msra.mxu3 %v1564_v9 }
 0x1a8   : > { %1650 = vmatpush.msra.mxu3 %v1563_v11 }
 0x1aa   : > { %1651 = vmatpush.msra.mxu3 %v1562_v14 }
 0x1ac   : > { %v1384_v12 = vpop.f32.mrf.mxu1  ;;  %1652 = vmatpush.msra.mxu3 %v1561_v19 }
 0x1ad   : > { %v1385_v17 = vadd.f32 %v1384_v12, %v1365_v13 }
 0x1ae   : > { %1653 = vmatpush.msra.mxu3 %v1560_v38 }
 0x1b0   : > { %1654 = vmatpush.msra.mxu3 %v1559_v21 }
 0x1b4   : > { %v1244_v42 = vpop.f32.mrf.mxu2 }
 0x1b5   : > { %v1245_v48 = vadd.f32 %v1244_v42, %v1225_v46 }
 0x1bc   : > { %v1324_v57 = vpop.f32.mrf.mxu2 }
 0x1bd   : > { %v1325_v61 = vadd.f32 %v1324_v57, %v1305_v58 }
 0x1c4   : > { %v1444_v23 = vpop.f32.mrf.mxu0 }
 0x1c5   : > { %v1445_v24 = vadd.f32 %v1444_v23, %v1182_v22 }
 0x1cd   : > { %v1464_v44 = vpop.f32.mrf.mxu1 }
 0x1ce   : > { %v1465_v26 = vadd.f32 %v1464_v44, %v1445_v24 }
 0x1d4   : > { %v1264_v50 = vpop.f32.mrf.mxu3  ;;  %v1404_v16 = vpop.f32.mrf.mxu2 }
 0x1d5   : > { %v1265_v52 = vadd.f32 %v1264_v50, %v1245_v48  ;;  %v1405_v18 = vadd.f32 %v1404_v16, %v1385_v17 }
 0x1d7   : > { %v1507_v55 = vmax.f32 %v1265_v52, 0.0 }
 0x1d9   : > { %1595 = vmatmul.f32.vlgmr.msra.gmra.mxu0 %v1507_v55 }
 0x1dc   : > { %v1344_v63 = vpop.f32.mrf.mxu3 }
 0x1dd   : > { %v1345_v0 = vadd.f32 %v1344_v63, %v1325_v61 }
 0x1df   : > { %v1508_v2 = vmax.f32 %v1345_v0, 0.0 }
 0x1e1   : > { %1615 = vmatmul.f32.vlgmr.msra.gmra.mxu1 %v1508_v2 }
 0x1f4   : > { %v1424_v15 = vpop.f32.mrf.mxu3  ;;  %v1484_v25 = vpop.f32.mrf.mxu2 }
 0x1f5   : > { %v1425_v20 = vadd.f32 %v1424_v15, %v1405_v18  ;;  %v1485_v27 = vadd.f32 %v1484_v25, %v1465_v26 }
 0x1f7   : > { %v1509_v39 = vmax.f32 %v1425_v20, 0.0 }
 0x1f9   : > { %1635 = vmatmul.f32.vlgmr.msra.gmra.mxu2 %v1509_v39 }
 0x214   : > { %v1504_v28 = vpop.f32.mrf.mxu3 }
 0x215   : > { %v1505_v30 = vadd.f32 %v1504_v28, %v1485_v27 }
 0x217   : > { %v1510_v31 = vmax.f32 %v1505_v30, 0.0 }
 0x219   : > { %1655 = vmatmul.f32.vlgmr.msra.gmra.mxu3 %v1510_v31 }
 0x256   : > { %v1596_v34 = vpop.f32.mrf.mxu0 }
 0x257   : > { %v1597_v29 = vadd.f32 %v1858_v32, %v1596_v34 }
 0x25e   : > { %v1616_v35 = vpop.f32.mrf.mxu1 }
 0x25f   : > { %v1617_v40 = vadd.f32 %v1616_v35, %v1597_v29 }
 0x27c   : > { %v1636_v37 = vpop.f32.mrf.mxu2 }
 0x27d   : > { %v1637_v41 = vadd.f32 %v1636_v37, %v1617_v40 }
 0x29c   : > { %v1656_v42 = vpop.f32.mrf.mxu3 }
 0x29d   : > { %v1657_v43 = vadd.f32 %v1656_v42, %v1637_v41 }
 0x29f   : > { %1659 = vst [vmem:[%s321_s3] sm:$0xff] %v1657_v43 }
 0x2a0   : > { %1976 = shalt.err (!%p1973_p8)
}
 0x2a1   : > { %1796 = dma.vmem_to_hbm [thread:$0]  (%p2106_p5), %s1674_s13, 128, %s1676_s16, %s1661_s19  }
 0x2a2 PF: > { %p1818_p9 = scmp.ge.s32.totalorder %s2019_s27, 2  ;;  %s1687_s8 = sand.u32 1, %s2007_s24  }
 0x2a3   : > { %s1688_s15 = scalar_lea.sflag [#allocation4], %s1687_s8 }
 0x2a4   : > { %p1809_p10 = pnand %p1818_p9, %p2110_p6 }
 0x2a6   : > { %p1810_p11 = pneg %p1809_p10 }
 0x2a8   : > { %2002 = dma.done.wait (%p1810_p11), %s1688_s15, 128  }
 0x2a9   : > { %2004 = vsyncadd (%p1810_p11), %s1688_s15, 4294967168  ;;  %p19_p12 = scmp.ge.s32.totalorder %s2093_s30, 4   ;;  %s2287_s24 = smov %s2011_s25 }
 0x2aa   : > { %s2288_s25 = smov %s2015_s26  ;;  %s2289_s26 = smov %s2104_s10 }
 0x2ab   : > { %s2290_s27 = smov %s2093_s30  ;;  %21 = sbr.rel (!%p19_p12) target bundleno = 8 (0x8), region = 96 }
 0x2b0   :  { %1694 = vsyncpa [#allocation3], 1 }
 0x2b1   :  { %1696 = vsyncpa [#allocation3 + $0x1], 1 }
 0x2b2   :  { %1697 = vsyncpa [#allocation6], 1 }
 0x2b3   :  { %1698 = vsyncpa [#allocation4], 1 }
 0x2b4   :  { %1700 = vsyncpa [#allocation4 + $0x1], 1 }

</bundles_post_ra>
